<compile_context>
chip_gen: v7x
topology: tpu7x:2x2x1
jax: 0.10.0
libtpu: 0.0.40
codegen_flags: <defaults>
</compile_context>

<pallas_src>
from functools import partial

import jax
import jax.numpy as jnp
from jax.experimental import pallas as pl
from jax.experimental.pallas import tpu as pltpu

NEG_SLOPE = 0.01   # F.leaky_relu default negative_slope
BN_EPS = 1e-5      # nn.BatchNorm2d default eps


# ----------------------------------------------------------------------------
# helpers
# ----------------------------------------------------------------------------
def _fixed(shape):
    """Whole-array block that stays resident across the (1-D) grid."""
    return pl.BlockSpec(shape, lambda i: (0,) * len(shape))


def _round_up(x, m):
    return (x + m - 1) // m * m


def _conv2d_size_out(size, kernel_size, stride):
    return (size - (kernel_size - 1) - 1) // stride + 1


def _leaky(y):
    # max(y, 0.01*y): 2 VPU ops instead of cmp+mul+select. f32 epilogue (v5e-safe).
    return jnp.maximum(y, NEG_SLOPE * y)


# ----------------------------------------------------------------------------
# Pallas kernels
# ----------------------------------------------------------------------------
def _conv1_kernel(p_ref, w_ref, shift_ref, o_ref):
    # [TM, K]bf16 @ [K, OC]bf16 on the MXU -> f32, then the folded
    # (conv bias + BatchNorm) per-channel shift and leaky_relu on the VPU.
    y = jnp.dot(p_ref[...], w_ref[...], preferred_element_type=jnp.float32)
    y = y + shift_ref[...]
    o_ref[...] = _leaky(y).astype(o_ref.dtype)


def _make_tail_kernel(num_actions, positions):
    """conv2 + conv3 + flatten + dueling head for the WHOLE batch at once.

    p2 row ordering is position-major / sample-minor: row = p * N + b, so each
    conv3 tap p is a contiguous static slice of the conv2 activation.
    """
    A = num_actions
    P = positions

    def kernel(p2_ref, w2_ref, s2_ref, w3_ref, s3_ref,
               wfc1_ref, bfc1_ref, whead_ref, bhead_ref, o_ref):
        nb = p2_ref.shape[0] // P                      # batch size (static)

        # ---- conv2: ONE batched matmul over all N * 9 output positions ----
        a2 = jnp.dot(p2_ref[...], w2_ref[...], preferred_element_type=jnp.float32)
        a2 = _leaky(a2 + s2_ref[...])                  # [P*N, C2] f32, VMEM-resident
        a2 = a2.astype(jnp.bfloat16)                   # cast once for the MXU

        # ---- conv3 (receptive field == full grid -> 1x1 output) ----
        # P independent [N, C2] @ [C2, C3] MXU issues summed on the VPU.
        f = jnp.dot(a2[0:nb, :], w3_ref[0], preferred_element_type=jnp.float32)
        for p in range(1, P):
            f = f + jnp.dot(a2[p * nb:(p + 1) * nb, :], w3_ref[p],
                            preferred_element_type=jnp.float32)
        f = _leaky(f + s3_ref[...])                    # [N, C3] == flattened features

        # ---- dueling head: fc1 adv|val concatenated into one matmul ----
        h = jnp.dot(f.astype(jnp.bfloat16), wfc1_ref[...],
                    preferred_element_type=jnp.float32) + bfc1_ref[...]
        h = _leaky(h)                                  # [N, 2H]

        # ---- merged block-diagonal head: adv (cols 0..A-1) and val (col A) ----
        y = jnp.dot(h.astype(jnp.bfloat16), whead_ref[...],
                    preferred_element_type=jnp.float32) + bhead_ref[...]   # [N, 128]
        adv = y * pl.reciprocal(1.0 + jnp.abs(y), approx=True)   # softsign (EUP)
        val = y[:, A:A + 1]                                      # no softsign on value
        mean_adv = jnp.mean(adv[:, :A], axis=1, keepdims=True)
        # Lane-dense [N, 128] store; only the first A columns are meaningful.
        o_ref[...] = val + adv - mean_adv

    return kernel


# ----------------------------------------------------------------------------
# pallas_call wrappers
# ----------------------------------------------------------------------------
def conv1_matmul(patches, w, shift):
    """patches [M, K] bf16 @ w [K, OC] bf16 + shift -> leaky_relu, bf16 [M, OC]."""
    M, K = patches.shape
    OC = w.shape[1]
    # Single block when small (no grid-step overhead, no ragged tail tile);
    # otherwise 256-row tiles to fill the 256-wide MXU on v6e/v7x (v5e's
    # 128-wide MXU is saturated at 256 as well).
    TM = M if M <= 1024 else 256
    return pl.pallas_call(
        _conv1_kernel,
        out_shape=jax.ShapeDtypeStruct((M, OC), jnp.bfloat16),
        grid=(pl.cdiv(M, TM),),
        in_specs=[
            pl.BlockSpec((TM, K), lambda i: (i, 0)),   # row tiles stream through
            _fixed((K, OC)),                           # weight stays resident
            _fixed((1, OC)),                           # folded shift stays resident
        ],
        out_specs=pl.BlockSpec((TM, OC), lambda i: (i, 0)),
        compiler_params=pltpu.CompilerParams(dimension_semantics=("parallel",)),
        cost_estimate=pl.CostEstimate(
            flops=2 * M * K * OC, transcendentals=0,
            bytes_accessed=2 * (M * K + K * OC + M * OC)),
    )(patches, w, shift)


def conv_tail_head(p2, w2, s2, w3, s3, wfc1, bfc1, whead, bhead, *, num_actions):
    """Fused, fully batched conv2 + conv3 + dueling head.

    p2: [P*N, K2] bf16 (position-major, sample-minor) -> [N, HP] f32 padded Q.
    """
    R, K2 = p2.shape
    P, C2, C3 = w3.shape
    assert R % P == 0
    N = R // P
    HP = whead.shape[1]
    kernel = _make_tail_kernel(num_actions, P)
    flops = 2 * (R * K2 * w2.shape[1] + P * N * C2 * C3
                 + N * wfc1.shape[0] * wfc1.shape[1] + N * whead.shape[0] * HP)
    bytes_accessed = 2 * (p2.size + w2.size + w3.size + wfc1.size + whead.size) + 4 * N * HP
    return pl.pallas_call(
        kernel,
        out_shape=jax.ShapeDtypeStruct((N, HP), jnp.float32),
        grid=(1,),
        in_specs=[
            _fixed(p2.shape),
            _fixed(w2.shape), _fixed(s2.shape),
            _fixed(w3.shape), _fixed(s3.shape),
            _fixed(wfc1.shape), _fixed(bfc1.shape),
            _fixed(whead.shape), _fixed(bhead.shape),
        ],
        out_specs=_fixed((N, HP)),
        compiler_params=pltpu.CompilerParams(dimension_semantics=("arbitrary",)),
        cost_estimate=pl.CostEstimate(
            flops=flops, transcendentals=N * HP, bytes_accessed=bytes_accessed),
    )(p2, w2, s2, w3, s3, wfc1, bfc1, whead, bhead)


# ----------------------------------------------------------------------------
# Host-side glue: channels-last im2col and one-time weight folding
# ----------------------------------------------------------------------------
def _im2col_nhwc(x, kh, kw, stride):
    """x: [N, H, W, C] -> ([N, OH, OW, KH*KW*C], OH, OW); columns ordered (kh, kw, c)."""
    N, H, W, C = x.shape
    OH = (H - kh) // stride + 1
    OW = (W - kw) // stride + 1
    taps = []
    for i in range(kh):
        for j in range(kw):
            taps.append(x[:, i:i + stride * OH:stride, j:j + stride * OW:stride, :])
    p = jnp.stack(taps, axis=3)                          # (N, OH, OW, KH*KW, C)
    return p.reshape(N, OH, OW, kh * kw * C), OH, OW


def _fold_conv(w, b, gamma, beta, mean, var):
    """Fold conv bias + eval-mode BatchNorm into a (KH, KW, C, OC) bf16 weight."""
    scale = gamma / jnp.sqrt(var + BN_EPS)               # [OC]
    w_f = jnp.transpose(w, (2, 3, 1, 0)) * scale         # (KH, KW, C, OC) * scale[oc]
    shift = (b - mean) * scale + beta                    # [OC]
    return w_f.astype(jnp.bfloat16), shift.reshape(1, -1).astype(jnp.float32)


def prepare_params(params):
    """One-time host-side folding / re-layout of the PyTorch-style parameters."""
    w1, s1 = _fold_conv(params["conv1_w"], params["conv1_b"], params["bn1_g"],
                        params["bn1_b"], params["bn1_m"], params["bn1_v"])
    w2, s2 = _fold_conv(params["conv2_w"], params["conv2_b"], params["bn2_g"],
                        params["bn2_b"], params["bn2_m"], params["bn2_v"])
    w3, s3 = _fold_conv(params["conv3_w"], params["conv3_b"], params["bn3_g"],
                        params["bn3_b"], params["bn3_m"], params["bn3_v"])
    kh1, kw1, c0, oc1 = w1.shape
    kh2, kw2, c1, oc2 = w2.shape
    kh3, kw3, c2, oc3 = w3.shape

    hidden = params["w1a"].shape[1]
    A = params["w2a"].shape[1]
    HP = _round_up(A + 1, 128)                            # lane-dense head width
    # Block-diagonal merged head: cols [0,A) = advantage, col A = value, rest 0.
    whead = jnp.zeros((2 * hidden, HP), jnp.float32)
    whead = whead.at[:hidden, :A].set(params["w2a"].astype(jnp.float32))
    whead = whead.at[hidden:, A].set(params["w2v"].astype(jnp.float32)[:, 0])
    bhead = jnp.zeros((HP,), jnp.float32)
    bhead = bhead.at[:A].set(params["b2a"]).at[A].set(params["b2v"][0])

    return {
        "w1": w1.reshape(kh1 * kw1 * c0, oc1), "s1": s1,
        "w2": w2.reshape(kh2 * kw2 * c1, oc2), "s2": s2,
        "w3": w3.reshape(kh3 * kw3, c2, oc3), "s3": s3,
        # dueling head: fc1 adv|val concatenated (one matmul)
        "wfc1": jnp.concatenate([params["w1a"], params["w1v"]], axis=1).astype(jnp.bfloat16),
        "bfc1": jnp.concatenate([params["b1a"], params["b1v"]]).reshape(1, -1).astype(jnp.float32),
        "whead": whead.astype(jnp.bfloat16),
        "bhead": bhead.reshape(1, -1),
    }


@partial(jax.jit, static_argnames=("outputs",))
def dueling_dqn_forward(x, prep, outputs):
    """x: NCHW float32 (PyTorch layout) -> Q values [N, outputs] float32."""
    N = x.shape[0]
    xh = jnp.transpose(x, (0, 2, 3, 1)).astype(jnp.bfloat16)   # NHWC once, bf16 operands

    # conv1 (single batched matmul kernel, row-tiled only when large)
    # TODO(synk): for real frame sizes (84x84) the 36-tap host-side im2col
    #   should move into the kernel via strided window reads to avoid the
    #   KH*KW HBM expansion.
    p1, oh1, ow1 = _im2col_nhwc(xh, 6, 6, 3)
    a1 = conv1_matmul(p1.reshape(N * oh1 * ow1, -1), prep["w1"], prep["s1"])
    a1 = a1.reshape(N, oh1, ow1, -1)                           # channels-last, no transpose

    # conv2 patches for the fused tail kernel
    p2, oh2, ow2 = _im2col_nhwc(a1, 4, 4, 2)
    oh3 = _conv2d_size_out(oh2, 3, 1)
    ow3 = _conv2d_size_out(ow2, 3, 1)
    assert oh3 == 1 and ow3 == 1, "fused tail kernel requires 1x1 conv3 output"
    # Position-major / sample-minor row order: row = (oy*OW2+ox)*N + b, so each
    # conv3 tap is a contiguous static slice inside the kernel.
    p2 = jnp.transpose(p2, (1, 2, 0, 3)).reshape(oh2 * ow2 * N, -1)

    y = conv_tail_head(p2, prep["w2"], prep["s2"], prep["w3"], prep["s3"],
                       prep["wfc1"], prep["bfc1"], prep["whead"], prep["bhead"],
                       num_actions=outputs)                    # [N, 128] padded
    return y[:, :outputs]


# ----------------------------------------------------------------------------
# Deterministic parameter construction (PyTorch layouts)
# ----------------------------------------------------------------------------
def make_params(key, channels, height, width, outputs, hidden=512):
    convw = _conv2d_size_out(_conv2d_size_out(_conv2d_size_out(width, 6, 3), 4, 2), 3, 1)
    convh = _conv2d_size_out(_conv2d_size_out(_conv2d_size_out(height, 6, 3), 4, 2), 3, 1)
    feat = convw * convh * 64

    ks = iter(jax.random.split(key, 32))
    nrm = lambda shape, s=0.05: jax.random.normal(next(ks), shape, jnp.float32) * s

    def bn(c):
        return (1.0 + 0.1 * jax.random.normal(next(ks), (c,), jnp.float32),   # gamma
                0.1 * jax.random.normal(next(ks), (c,), jnp.float32),         # beta
                0.1 * jax.random.normal(next(ks), (c,), jnp.float32),         # running_mean
                1.0 + 0.1 * jnp.abs(jax.random.normal(next(ks), (c,), jnp.float32)))  # running_var

    p = {}
    p["conv1_w"], p["conv1_b"] = nrm((32, channels, 6, 6)), nrm((32,))
    p["bn1_g"], p["bn1_b"], p["bn1_m"], p["bn1_v"] = bn(32)
    p["conv2_w"], p["conv2_b"] = nrm((64, 32, 4, 4)), nrm((64,))
    p["bn2_g"], p["bn2_b"], p["bn2_m"], p["bn2_v"] = bn(64)
    p["conv3_w"], p["conv3_b"] = nrm((64, 64, 3, 3)), nrm((64,))
    p["bn3_g"], p["bn3_b"], p["bn3_m"], p["bn3_v"] = bn(64)
    # Linear weights stored as [in, out] (== torch weight.T)
    p["w1a"], p["b1a"] = nrm((feat, hidden)), nrm((hidden,))
    p["w2a"], p["b2a"] = nrm((hidden, outputs)), nrm((outputs,))
    p["w1v"], p["b1v"] = nrm((feat, hidden)), nrm((hidden,))
    p["w2v"], p["b2v"] = nrm((hidden, 1)), nrm((1,))
    return p


if __name__ == "__main__":
    # batch=2, channels=4, 30x30 spatial (smallest that keeps all three conv
    # layers valid and conv3 output 1x1), 7 actions (SIMPLE_MOVEMENT-sized head).
    N, C, H, W = 2, 4, 30, 30
    OUTPUTS = 7

    key = jax.random.PRNGKey(0)
    kx, kp = jax.random.split(key)
    x = jax.random.normal(kx, (N, C, H, W), jnp.float32)
    params = make_params(kp, C, H, W, OUTPUTS)
    prep = prepare_params(params)

    q = dueling_dqn_forward(x, prep, outputs=OUTPUTS)          # (N, OUTPUTS)
    jax.block_until_ready(q)
    assert q.shape == (N, OUTPUTS) and q.dtype == jnp.float32
    print("KERNEL_OK")
</pallas_src>

<mosaic_0001>
module attributes {stable_mosaic.version = 11 : i64} {
  func.func @_conv1_kernel(%arg0: i32, %arg1: memref<162x144xbf16, #tpu.memory_space<vmem>>, %arg2: memref<144x32xbf16, #tpu.memory_space<vmem>>, %arg3: memref<1x32xf32, #tpu.memory_space<vmem>>, %arg4: memref<162x32xbf16, #tpu.memory_space<vmem>>) attributes {dimension_semantics = [#tpu.dimension_semantics<parallel>], iteration_bounds = array<i64: 1>, scalar_prefetch = 0 : i64, scratch_operands = 0 : i64, tpu.core_type = #tpu.core_type<tc>, window_params = [{transform_indices = @transform_0, window_bounds = array<i64: 162, 144>}, {pipeline_mode = #tpu.pipeline_mode<synchronous>, transform_indices = @transform_1, window_bounds = array<i64: 144, 32>}, {pipeline_mode = #tpu.pipeline_mode<synchronous>, transform_indices = @transform_2, window_bounds = array<i64: 1, 32>}, {transform_indices = @transform_3, window_bounds = array<i64: 162, 32>}]} {
    %c0 = arith.constant 0 : index
    %c0_0 = arith.constant 0 : index
    %0 = vector.load %arg1[%c0, %c0_0] : memref<162x144xbf16, #tpu.memory_space<vmem>>, vector<162x144xbf16>
    %c0_1 = arith.constant 0 : index
    %c0_2 = arith.constant 0 : index
    %1 = vector.load %arg2[%c0_1, %c0_2] : memref<144x32xbf16, #tpu.memory_space<vmem>>, vector<144x32xbf16>
    %cst = arith.constant dense<0.000000e+00> : vector<162x32xf32>
    %2 = tpu.matmul %0, %1, %cst {dimension_numbers = #tpu.dot_dimension_numbers<[1], [0], [0], [1], [0, 0, 1, 1], [], []>} : vector<162x144xbf16>, vector<144x32xbf16>, vector<162x32xf32> -> vector<162x32xf32>
    %c0_3 = arith.constant 0 : index
    %c0_4 = arith.constant 0 : index
    %3 = vector.load %arg3[%c0_3, %c0_4] : memref<1x32xf32, #tpu.memory_space<vmem>>, vector<1x32xf32>
    %4 = vector.broadcast %3 : vector<1x32xf32> to vector<162x32xf32>
    %5 = arith.addf %2, %4 : vector<162x32xf32>
    %cst_5 = arith.constant 0.00999999977 : f32
    %6 = vector.broadcast %cst_5 : f32 to vector<162x32xf32>
    %7 = arith.mulf %6, %5 : vector<162x32xf32>
    %8 = arith.maximumf %5, %7 : vector<162x32xf32>
    %9 = arith.truncf %8 : vector<162x32xf32> to vector<162x32xbf16>
    %c0_6 = arith.constant 0 : index
    %c0_7 = arith.constant 0 : index
    %10 = vector.load %arg4[%c0_6, %c0_7] : memref<162x32xbf16, #tpu.memory_space<vmem>>, vector<162x32xbf16>
    tpu.vector_store %arg4[%c0_6, %c0_7], %9 {strides = array<i32>} : memref<162x32xbf16, #tpu.memory_space<vmem>>, vector<162x32xbf16>,
    return
  }
  func.func @transform_0(%arg0: i32) -> (i32, i32) {
    %c0_i32 = arith.constant 0 : i32
    %c0_i32_0 = arith.constant 0 : i32
    return %arg0, %c0_i32 : i32, i32
  }
  func.func @transform_1(%arg0: i32) -> (i32, i32) {
    %c0_i32 = arith.constant 0 : i32
    %c0_i32_0 = arith.constant 0 : i32
    %c0_i32_1 = arith.constant 0 : i32
    return %c0_i32, %c0_i32_0 : i32, i32
  }
  func.func @transform_2(%arg0: i32) -> (i32, i32) {
    %c0_i32 = arith.constant 0 : i32
    %c0_i32_0 = arith.constant 0 : i32
    %c0_i32_1 = arith.constant 0 : i32
    return %c0_i32, %c0_i32_0 : i32, i32
  }
  func.func @transform_3(%arg0: i32) -> (i32, i32) {
    %c0_i32 = arith.constant 0 : i32
    %c0_i32_0 = arith.constant 0 : i32
    return %arg0, %c0_i32 : i32, i32
  }
}

module attributes {stable_mosaic.version = 11 : i64} {
  func.func @kernel(%arg0: i32, %arg1: memref<18x512xbf16, #tpu.memory_space<vmem>>, %arg2: memref<512x64xbf16, #tpu.memory_space<vmem>>, %arg3: memref<1x64xf32, #tpu.memory_space<vmem>>, %arg4: memref<9x64x64xbf16, #tpu.memory_space<vmem>>, %arg5: memref<1x64xf32, #tpu.memory_space<vmem>>, %arg6: memref<64x1024xbf16, #tpu.memory_space<vmem>>, %arg7: memref<1x1024xf32, #tpu.memory_space<vmem>>, %arg8: memref<1024x128xbf16, #tpu.memory_space<vmem>>, %arg9: memref<1x128xf32, #tpu.memory_space<vmem>>, %arg10: memref<2x128xf32, #tpu.memory_space<vmem>>) attributes {dimension_semantics = [#tpu.dimension_semantics<arbitrary>], iteration_bounds = array<i64: 1>, scalar_prefetch = 0 : i64, scratch_operands = 0 : i64, tpu.core_type = #tpu.core_type<tc>, window_params = [{pipeline_mode = #tpu.pipeline_mode<synchronous>, transform_indices = @transform_0, window_bounds = array<i64: 18, 512>}, {pipeline_mode = #tpu.pipeline_mode<synchronous>, transform_indices = @transform_1, window_bounds = array<i64: 512, 64>}, {pipeline_mode = #tpu.pipeline_mode<synchronous>, transform_indices = @transform_2, window_bounds = array<i64: 1, 64>}, {pipeline_mode = #tpu.pipeline_mode<synchronous>, transform_indices = @transform_3, window_bounds = array<i64: 9, 64, 64>}, {pipeline_mode = #tpu.pipeline_mode<synchronous>, transform_indices = @transform_4, window_bounds = array<i64: 1, 64>}, {pipeline_mode = #tpu.pipeline_mode<synchronous>, transform_indices = @transform_5, window_bounds = array<i64: 64, 1024>}, {pipeline_mode = #tpu.pipeline_mode<synchronous>, transform_indices = @transform_6, window_bounds = array<i64: 1, 1024>}, {pipeline_mode = #tpu.pipeline_mode<synchronous>, transform_indices = @transform_7, window_bounds = array<i64: 1024, 128>}, {pipeline_mode = #tpu.pipeline_mode<synchronous>, transform_indices = @transform_8, window_bounds = array<i64: 1, 128>}, {pipeline_mode = #tpu.pipeline_mode<synchronous>, transform_indices = @transform_9, window_bounds = array<i64: 2, 128>}]} {
    %c0 = arith.constant 0 : index
    %c0_0 = arith.constant 0 : index
    %0 = vector.load %arg1[%c0, %c0_0] : memref<18x512xbf16, #tpu.memory_space<vmem>>, vector<18x512xbf16>
    %c0_1 = arith.constant 0 : index
    %c0_2 = arith.constant 0 : index
    %1 = vector.load %arg2[%c0_1, %c0_2] : memref<512x64xbf16, #tpu.memory_space<vmem>>, vector<512x64xbf16>
    %cst = arith.constant dense<0.000000e+00> : vector<18x64xf32>
    %2 = tpu.matmul %0, %1, %cst {dimension_numbers = #tpu.dot_dimension_numbers<[1], [0], [0], [1], [0, 0, 1, 1], [], []>} : vector<18x512xbf16>, vector<512x64xbf16>, vector<18x64xf32> -> vector<18x64xf32>
    %c0_3 = arith.constant 0 : index
    %c0_4 = arith.constant 0 : index
    %3 = vector.load %arg3[%c0_3, %c0_4] : memref<1x64xf32, #tpu.memory_space<vmem>>, vector<1x64xf32>
    %4 = vector.broadcast %3 : vector<1x64xf32> to vector<18x64xf32>
    %5 = arith.addf %2, %4 : vector<18x64xf32>
    %cst_5 = arith.constant 0.00999999977 : f32
    %6 = vector.broadcast %cst_5 : f32 to vector<18x64xf32>
    %7 = arith.mulf %6, %5 : vector<18x64xf32>
    %8 = arith.maximumf %5, %7 : vector<18x64xf32>
    %9 = arith.truncf %8 : vector<18x64xf32> to vector<18x64xbf16>
    %10 = vector.extract_strided_slice %9 {offsets = [0, 0], sizes = [2, 64], strides = [1, 1]} : vector<18x64xbf16> to vector<2x64xbf16>
    %c0_6 = arith.constant 0 : index
    %c0_7 = arith.constant 0 : index
    %c0_8 = arith.constant 0 : index
    %11 = vector.load %arg4[%c0_6, %c0_7, %c0_8] : memref<9x64x64xbf16, #tpu.memory_space<vmem>>, vector<1x64x64xbf16>
    %12 = vector.shape_cast %11 : vector<1x64x64xbf16> to vector<64x64xbf16>
    %cst_9 = arith.constant dense<0.000000e+00> : vector<2x64xf32>
    %13 = tpu.matmul %10, %12, %cst_9 {dimension_numbers = #tpu.dot_dimension_numbers<[1], [0], [0], [1], [0, 0, 1, 1], [], []>} : vector<2x64xbf16>, vector<64x64xbf16>, vector<2x64xf32> -> vector<2x64xf32>
    %14 = vector.extract_strided_slice %9 {offsets = [2, 0], sizes = [2, 64], strides = [1, 1]} : vector<18x64xbf16> to vector<2x64xbf16>
    %c1 = arith.constant 1 : index
    %c0_10 = arith.constant 0 : index
    %c0_11 = arith.constant 0 : index
    %15 = vector.load %arg4[%c1, %c0_10, %c0_11] : memref<9x64x64xbf16, #tpu.memory_space<vmem>>, vector<1x64x64xbf16>
    %16 = vector.shape_cast %15 : vector<1x64x64xbf16> to vector<64x64xbf16>
    %cst_12 = arith.constant dense<0.000000e+00> : vector<2x64xf32>
    %17 = tpu.matmul %14, %16, %cst_12 {dimension_numbers = #tpu.dot_dimension_numbers<[1], [0], [0], [1], [0, 0, 1, 1], [], []>} : vector<2x64xbf16>, vector<64x64xbf16>, vector<2x64xf32> -> vector<2x64xf32>
    %18 = arith.addf %13, %17 : vector<2x64xf32>
    %19 = vector.extract_strided_slice %9 {offsets = [4, 0], sizes = [2, 64], strides = [1, 1]} : vector<18x64xbf16> to vector<2x64xbf16>
    %c2 = arith.constant 2 : index
    %c0_13 = arith.constant 0 : index
    %c0_14 = arith.constant 0 : index
    %20 = vector.load %arg4[%c2, %c0_13, %c0_14] : memref<9x64x64xbf16, #tpu.memory_space<vmem>>, vector<1x64x64xbf16>
    %21 = vector.shape_cast %20 : vector<1x64x64xbf16> to vector<64x64xbf16>
    %cst_15 = arith.constant dense<0.000000e+00> : vector<2x64xf32>
    %22 = tpu.matmul %19, %21, %cst_15 {dimension_numbers = #tpu.dot_dimension_numbers<[1], [0], [0], [1], [0, 0, 1, 1], [], []>} : vector<2x64xbf16>, vector<64x64xbf16>, vector<2x64xf32> -> vector<2x64xf32>
    %23 = arith.addf %18, %22 : vector<2x64xf32>
    %24 = vector.extract_strided_slice %9 {offsets = [6, 0], sizes = [2, 64], strides = [1, 1]} : vector<18x64xbf16> to vector<2x64xbf16>
    %c3 = arith.constant 3 : index
    %c0_16 = arith.constant 0 : index
    %c0_17 = arith.constant 0 : index
    %25 = vector.load %arg4[%c3, %c0_16, %c0_17] : memref<9x64x64xbf16, #tpu.memory_space<vmem>>, vector<1x64x64xbf16>
    %26 = vector.shape_cast %25 : vector<1x64x64xbf16> to vector<64x64xbf16>
    %cst_18 = arith.constant dense<0.000000e+00> : vector<2x64xf32>
    %27 = tpu.matmul %24, %26, %cst_18 {dimension_numbers = #tpu.dot_dimension_numbers<[1], [0], [0], [1], [0, 0, 1, 1], [], []>} : vector<2x64xbf16>, vector<64x64xbf16>, vector<2x64xf32> -> vector<2x64xf32>
    %28 = arith.addf %23, %27 : vector<2x64xf32>
    %29 = vector.extract_strided_slice %9 {offsets = [8, 0], sizes = [2, 64], strides = [1, 1]} : vector<18x64xbf16> to vector<2x64xbf16>
    %c4 = arith.constant 4 : index
    %c0_19 = arith.constant 0 : index
    %c0_20 = arith.constant 0 : index
    %30 = vector.load %arg4[%c4, %c0_19, %c0_20] : memref<9x64x64xbf16, #tpu.memory_space<vmem>>, vector<1x64x64xbf16>
    %31 = vector.shape_cast %30 : vector<1x64x64xbf16> to vector<64x64xbf16>
    %cst_21 = arith.constant dense<0.000000e+00> : vector<2x64xf32>
    %32 = tpu.matmul %29, %31, %cst_21 {dimension_numbers = #tpu.dot_dimension_numbers<[1], [0], [0], [1], [0, 0, 1, 1], [], []>} : vector<2x64xbf16>, vector<64x64xbf16>, vector<2x64xf32> -> vector<2x64xf32>
    %33 = arith.addf %28, %32 : vector<2x64xf32>
    %34 = vector.extract_strided_slice %9 {offsets = [10, 0], sizes = [2, 64], strides = [1, 1]} : vector<18x64xbf16> to vector<2x64xbf16>
    %c5 = arith.constant 5 : index
    %c0_22 = arith.constant 0 : index
    %c0_23 = arith.constant 0 : index
    %35 = vector.load %arg4[%c5, %c0_22, %c0_23] : memref<9x64x64xbf16, #tpu.memory_space<vmem>>, vector<1x64x64xbf16>
    %36 = vector.shape_cast %35 : vector<1x64x64xbf16> to vector<64x64xbf16>
    %cst_24 = arith.constant dense<0.000000e+00> : vector<2x64xf32>
    %37 = tpu.matmul %34, %36, %cst_24 {dimension_numbers = #tpu.dot_dimension_numbers<[1], [0], [0], [1], [0, 0, 1, 1], [], []>} : vector<2x64xbf16>, vector<64x64xbf16>, vector<2x64xf32> -> vector<2x64xf32>
    %38 = arith.addf %33, %37 : vector<2x64xf32>
    %39 = vector.extract_strided_slice %9 {offsets = [12, 0], sizes = [2, 64], strides = [1, 1]} : vector<18x64xbf16> to vector<2x64xbf16>
    %c6 = arith.constant 6 : index
    %c0_25 = arith.constant 0 : index
    %c0_26 = arith.constant 0 : index
    %40 = vector.load %arg4[%c6, %c0_25, %c0_26] : memref<9x64x64xbf16, #tpu.memory_space<vmem>>, vector<1x64x64xbf16>
    %41 = vector.shape_cast %40 : vector<1x64x64xbf16> to vector<64x64xbf16>
    %cst_27 = arith.constant dense<0.000000e+00> : vector<2x64xf32>
    %42 = tpu.matmul %39, %41, %cst_27 {dimension_numbers = #tpu.dot_dimension_numbers<[1], [0], [0], [1], [0, 0, 1, 1], [], []>} : vector<2x64xbf16>, vector<64x64xbf16>, vector<2x64xf32> -> vector<2x64xf32>
    %43 = arith.addf %38, %42 : vector<2x64xf32>
    %44 = vector.extract_strided_slice %9 {offsets = [14, 0], sizes = [2, 64], strides = [1, 1]} : vector<18x64xbf16> to vector<2x64xbf16>
    %c7 = arith.constant 7 : index
    %c0_28 = arith.constant 0 : index
    %c0_29 = arith.constant 0 : index
    %45 = vector.load %arg4[%c7, %c0_28, %c0_29] : memref<9x64x64xbf16, #tpu.memory_space<vmem>>, vector<1x64x64xbf16>
    %46 = vector.shape_cast %45 : vector<1x64x64xbf16> to vector<64x64xbf16>
    %cst_30 = arith.constant dense<0.000000e+00> : vector<2x64xf32>
    %47 = tpu.matmul %44, %46, %cst_30 {dimension_numbers = #tpu.dot_dimension_numbers<[1], [0], [0], [1], [0, 0, 1, 1], [], []>} : vector<2x64xbf16>, vector<64x64xbf16>, vector<2x64xf32> -> vector<2x64xf32>
    %48 = arith.addf %43, %47 : vector<2x64xf32>
    %49 = vector.extract_strided_slice %9 {offsets = [16, 0], sizes = [2, 64], strides = [1, 1]} : vector<18x64xbf16> to vector<2x64xbf16>
    %c8 = arith.constant 8 : index
    %c0_31 = arith.constant 0 : index
    %c0_32 = arith.constant 0 : index
    %50 = vector.load %arg4[%c8, %c0_31, %c0_32] : memref<9x64x64xbf16, #tpu.memory_space<vmem>>, vector<1x64x64xbf16>
    %51 = vector.shape_cast %50 : vector<1x64x64xbf16> to vector<64x64xbf16>
    %cst_33 = arith.constant dense<0.000000e+00> : vector<2x64xf32>
    %52 = tpu.matmul %49, %51, %cst_33 {dimension_numbers = #tpu.dot_dimension_numbers<[1], [0], [0], [1], [0, 0, 1, 1], [], []>} : vector<2x64xbf16>, vector<64x64xbf16>, vector<2x64xf32> -> vector<2x64xf32>
    %53 = arith.addf %48, %52 : vector<2x64xf32>
    %c0_34 = arith.constant 0 : index
    %c0_35 = arith.constant 0 : index
    %54 = vector.load %arg5[%c0_34, %c0_35] : memref<1x64xf32, #tpu.memory_space<vmem>>, vector<1x64xf32>
    %55 = vector.broadcast %54 : vector<1x64xf32> to vector<2x64xf32>
    %56 = arith.addf %53, %55 : vector<2x64xf32>
    %cst_36 = arith.constant 0.00999999977 : f32
    %57 = vector.broadcast %cst_36 : f32 to vector<2x64xf32>
    %58 = arith.mulf %57, %56 : vector<2x64xf32>
    %59 = arith.maximumf %56, %58 : vector<2x64xf32>
    %60 = arith.truncf %59 : vector<2x64xf32> to vector<2x64xbf16>
    %c0_37 = arith.constant 0 : index
    %c0_38 = arith.constant 0 : index
    %61 = vector.load %arg6[%c0_37, %c0_38] : memref<64x1024xbf16, #tpu.memory_space<vmem>>, vector<64x1024xbf16>
    %cst_39 = arith.constant dense<0.000000e+00> : vector<2x1024xf32>
    %62 = tpu.matmul %60, %61, %cst_39 {dimension_numbers = #tpu.dot_dimension_numbers<[1], [0], [0], [1], [0, 0, 1, 1], [], []>} : vector<2x64xbf16>, vector<64x1024xbf16>, vector<2x1024xf32> -> vector<2x1024xf32>
    %c0_40 = arith.constant 0 : index
    %c0_41 = arith.constant 0 : index
    %63 = vector.load %arg7[%c0_40, %c0_41] : memref<1x1024xf32, #tpu.memory_space<vmem>>, vector<1x1024xf32>
    %64 = vector.broadcast %63 : vector<1x1024xf32> to vector<2x1024xf32>
    %65 = arith.addf %62, %64 : vector<2x1024xf32>
    %cst_42 = arith.constant 0.00999999977 : f32
    %66 = vector.broadcast %cst_42 : f32 to vector<2x1024xf32>
    %67 = arith.mulf %66, %65 : vector<2x1024xf32>
    %68 = arith.maximumf %65, %67 : vector<2x1024xf32>
    %69 = arith.truncf %68 : vector<2x1024xf32> to vector<2x1024xbf16>
    %c0_43 = arith.constant 0 : index
    %c0_44 = arith.constant 0 : index
    %70 = vector.load %arg8[%c0_43, %c0_44] : memref<1024x128xbf16, #tpu.memory_space<vmem>>, vector<1024x128xbf16>
    %cst_45 = arith.constant dense<0.000000e+00> : vector<2x128xf32>
    %71 = tpu.matmul %69, %70, %cst_45 {dimension_numbers = #tpu.dot_dimension_numbers<[1], [0], [0], [1], [0, 0, 1, 1], [], []>} : vector<2x1024xbf16>, vector<1024x128xbf16>, vector<2x128xf32> -> vector<2x128xf32>
    %c0_46 = arith.constant 0 : index
    %c0_47 = arith.constant 0 : index
    %72 = vector.load %arg9[%c0_46, %c0_47] : memref<1x128xf32, #tpu.memory_space<vmem>>, vector<1x128xf32>
    %73 = vector.broadcast %72 : vector<1x128xf32> to vector<2x128xf32>
    %74 = arith.addf %71, %73 : vector<2x128xf32>
    %75 = math.absf %74 : vector<2x128xf32>
    %cst_48 = arith.constant 1.000000e+00 : f32
    %76 = vector.broadcast %cst_48 : f32 to vector<2x128xf32>
    %77 = arith.addf %76, %75 : vector<2x128xf32>
    %78 = tpu.reciprocal %77 {approx = true} : vector<2x128xf32> -> vector<2x128xf32>
    %79 = arith.mulf %74, %78 : vector<2x128xf32>
    %80 = vector.extract_strided_slice %74 {offsets = [0, 7], sizes = [2, 1], strides = [1, 1]} : vector<2x128xf32> to vector<2x1xf32>
    %81 = vector.extract_strided_slice %79 {offsets = [0, 0], sizes = [2, 7], strides = [1, 1]} : vector<2x128xf32> to vector<2x7xf32>
    %cst_49 = arith.constant dense<0.000000e+00> : vector<2xf32>
    %82 = vector.multi_reduction <add>, %81, %cst_49 [1] : vector<2x7xf32> to vector<2xf32>
    %83 = vector.shape_cast %82 : vector<2xf32> to vector<2x1xf32>
    %cst_50 = arith.constant 7.000000e+00 : f32
    %84 = vector.broadcast %cst_50 : f32 to vector<2x1xf32>
    %85 = arith.divf %83, %84 : vector<2x1xf32>
    %86 = vector.broadcast %80 : vector<2x1xf32> to vector<2x128xf32>
    %87 = arith.addf %86, %79 : vector<2x128xf32>
    %88 = vector.broadcast %85 : vector<2x1xf32> to vector<2x128xf32>
    %89 = arith.subf %87, %88 : vector<2x128xf32>
    %c0_51 = arith.constant 0 : index
    %c0_52 = arith.constant 0 : index
    %90 = vector.load %arg10[%c0_51, %c0_52] : memref<2x128xf32, #tpu.memory_space<vmem>>, vector<2x128xf32>
    tpu.vector_store %arg10[%c0_51, %c0_52], %89 {strides = array<i32>} : memref<2x128xf32, #tpu.memory_space<vmem>>, vector<2x128xf32>,
    return
  }
  func.func @transform_0(%arg0: i32) -> (i32, i32) {
    %c0_i32 = arith.constant 0 : i32
    %c0_i32_0 = arith.constant 0 : i32
    %c0_i32_1 = arith.constant 0 : i32
    return %c0_i32, %c0_i32_0 : i32, i32
  }
  func.func @transform_1(%arg0: i32) -> (i32, i32) {
    %c0_i32 = arith.constant 0 : i32
    %c0_i32_0 = arith.constant 0 : i32
    %c0_i32_1 = arith.constant 0 : i32
    return %c0_i32, %c0_i32_0 : i32, i32
  }
  func.func @transform_2(%arg0: i32) -> (i32, i32) {
    %c0_i32 = arith.constant 0 : i32
    %c0_i32_0 = arith.constant 0 : i32
    %c0_i32_1 = arith.constant 0 : i32
    return %c0_i32, %c0_i32_0 : i32, i32
  }
  func.func @transform_3(%arg0: i32) -> (i32, i32, i32) {
    %c0_i32 = arith.constant 0 : i32
    %c0_i32_0 = arith.constant 0 : i32
    %c0_i32_1 = arith.constant 0 : i32
    %c0_i32_2 = arith.constant 0 : i32
    return %c0_i32, %c0_i32_0, %c0_i32_1 : i32, i32, i32
  }
  func.func @transform_4(%arg0: i32) -> (i32, i32) {
    %c0_i32 = arith.constant 0 : i32
    %c0_i32_0 = arith.constant 0 : i32
    %c0_i32_1 = arith.constant 0 : i32
    return %c0_i32, %c0_i32_0 : i32, i32
  }
  func.func @transform_5(%arg0: i32) -> (i32, i32) {
    %c0_i32 = arith.constant 0 : i32
    %c0_i32_0 = arith.constant 0 : i32
    %c0_i32_1 = arith.constant 0 : i32
    return %c0_i32, %c0_i32_0 : i32, i32
  }
  func.func @transform_6(%arg0: i32) -> (i32, i32) {
    %c0_i32 = arith.constant 0 : i32
    %c0_i32_0 = arith.constant 0 : i32
    %c0_i32_1 = arith.constant 0 : i32
    return %c0_i32, %c0_i32_0 : i32, i32
  }
  func.func @transform_7(%arg0: i32) -> (i32, i32) {
    %c0_i32 = arith.constant 0 : i32
    %c0_i32_0 = arith.constant 0 : i32
    %c0_i32_1 = arith.constant 0 : i32
    return %c0_i32, %c0_i32_0 : i32, i32
  }
  func.func @transform_8(%arg0: i32) -> (i32, i32) {
    %c0_i32 = arith.constant 0 : i32
    %c0_i32_0 = arith.constant 0 : i32
    %c0_i32_1 = arith.constant 0 : i32
    return %c0_i32, %c0_i32_0 : i32, i32
  }
  func.func @transform_9(%arg0: i32) -> (i32, i32) {
    %c0_i32 = arith.constant 0 : i32
    %c0_i32_0 = arith.constant 0 : i32
    %c0_i32_1 = arith.constant 0 : i32
    return %c0_i32, %c0_i32_0 : i32, i32
  }
}

</mosaic_0001>

<bundles_post_ra>
// kernel: dueling_dqn_forward.2
= control target key start
LH: loop header
LB: loop body
LE: loop exit
PB: predicated region body
PF: predicated region fallthrough
CT: control target
= control target key end

     0   :  { %v664_v0 = vmov 0   ;;  %vm211_vm0 = vcmask 130048   ;;  %vm492_vm1 = vcmask 257024   ;;  %vm513_vm2 = vcmask 253952   ;;  %s895_s1 = inlined_call_operand.vmem [shape: bf16[144,32], index: 1, kind: input, shape index: {}]   ;;  %s896_s0 = inlined_call_operand.vmem [shape: bf16[162,144], index: 0, kind: input, shape index: {}]   ;;  %s897_s2 = inlined_call_operand.vmem [shape: f32[1,32], index: 2, kind: input, shape index: {}]   ;;  %s898_s3 = inlined_call_operand.vmem [shape: bf16[162,32], index: 3, kind: output, shape index: {}]  }
   0x1   :  { %245 = vmatprep.subr.bf16.mxu0 %v664_v0  ;;  %v623_v1 = vld [vmem:[%s895_s1] sm:$0xff]   ;;  %604 = vmatprep.subr.bf16.mxu1 %v664_v0  ;;  %v624_v2 = vld [vmem:[%s895_s1 + $0x8] sm:$0xff]   ;;  %v625_v3 = vld [vmem:[%s895_s1 + $0x10] sm:$0xff]  }
   0x2   :  { %246 = vmatpush1.bf16.msra.mxu0 %v623_v1  ;;  %613 = vmatpush1.bf16.msra.mxu1 %v623_v1  ;;  %v626_v4 = vld [vmem:[%s895_s1 + $0x18] sm:$0xff]   ;;  %v634_v5 = vld [vmem:[%s896_s0 + $0x4] ss:$8 sps:$4 sm:$0xff]   ;;  %v629_v9 = vld [vmem:[%s895_s1 + $0x30] sm:$0xff]  }
   0x3   :  { %247 = vmatprep.subr.bf16.mxu0 %v664_v0  ;;  %605 = vmatprep.subr.bf16.mxu1 %v664_v0  ;;  %v637_v6 = vld [vmem:[%s896_s0 + $0x64] ss:$8 sps:$4 sm:$0xff]   ;;  %v630_v10 = vld [vmem:[%s895_s1 + $0x38] sm:$0xff]   ;;  %v632_v12 = vld [vmem:[%s896_s0] ss:$8 sps:$4 sm:$0xff]  }
   0x4   :  { %551 = vmatprep.mubr.msk.bf16.mxu0 %vm211_vm0, %v634_v5  ;;  %557 = vmatprep.mubr.msk.bf16.mxu1 %vm211_vm0, %v637_v6  ;;  %v627_v7 = vld [vmem:[%s895_s1 + $0x20] sm:$0xff]   ;;  %v628_v8 = vld [vmem:[%s895_s1 + $0x28] sm:$0xff]   ;;  %v638_v14 = vld [vmem:[%s896_s0 + $0x14] ss:$8 sps:$4 sm:$0xff]  }
   0x5   :  { %v631_v11 = vld [vmem:[%s895_s1 + $0x40] sm:$0xff]   ;;  %v641_v15 = vld [vmem:[%s896_s0 + $0x74] ss:$8 sps:$4 sm:$0xff]   ;;  %v640_v16 = vld [vmem:[%s896_s0 + $0x10] ss:$8 sps:$4 sm:$0xff]  }
   0x6   :  { %248 = vmatpush1.bf16.msra.mxu0 %v624_v2  ;;  %614 = vmatpush1.bf16.msra.mxu1 %v624_v2  ;;  %v635_v13 = vld [vmem:[%s896_s0 + $0x60] ss:$8 sps:$4 sm:$0xff]   ;;  %v643_v17 = vld [vmem:[%s896_s0 + $0x70] ss:$8 sps:$4 sm:$0xff]   ;;  %v644_v18 = vld [vmem:[%s896_s0 + $0x24] ss:$8 sps:$4 sm:$0xff]  }
   0x7   :  { %249 = vmatprep.subr.bf16.mxu0 %v664_v0  ;;  %606 = vmatprep.subr.bf16.mxu1 %v664_v0  ;;  %v647_v19 = vld [vmem:[%s896_s0 + $0x84] ss:$8 sps:$4 sm:$0xff]   ;;  %v646_v20 = vld [vmem:[%s896_s0 + $0x20] ss:$8 sps:$4 sm:$0xff]   ;;  %v650_v22 = vld [vmem:[%s896_s0 + $0x34] ss:$8 sps:$4 sm:$0xff]  }
   0x8   :  { %v649_v21 = vld [vmem:[%s896_s0 + $0x80] ss:$8 sps:$4 sm:$0xff]   ;;  %v653_v23 = vld [vmem:[%s896_s0 + $0x94] ss:$8 sps:$4 sm:$0xff]   ;;  %v652_v25 = vld [vmem:[%s896_s0 + $0x30] ss:$8 sps:$4 sm:$0xff]  }
   0x9   :  { %v35_v24 = vld [vmem:[%s896_s0 + $0xa0] sm:$0x11]  ;;  %v655_v26 = vld [vmem:[%s896_s0 + $0x90] ss:$8 sps:$4 sm:$0xff]   ;;  %v660_v31 = vld [vmem:[%s896_s0 + $0x54] ss:$8 sps:$4 sm:$0xff]  }
   0xa   :  { %250 = vmatpush1.bf16.msra.mxu0 %v625_v3  ;;  %615 = vmatpush1.bf16.msra.mxu1 %v625_v3  ;;  %v656_v27 = vld [vmem:[%s896_s0 + $0x44] ss:$8 sps:$4 sm:$0xff]   ;;  %v541_v28 = vcombine.high %v35_v24, %v35_v24  ;;  %v658_v29 = vld [vmem:[%s896_s0 + $0x40] ss:$8 sps:$4 sm:$0xff]   ;;  %v540_v30 = vcombine.low %v35_v24, %v35_v24  ;;  %v663_v32 = vld [vmem:[%s896_s0 + $0x50] ss:$8 sps:$4 sm:$0xff]  }
   0xb   :  { %251 = vmatprep.subr.bf16.mxu0 %v664_v0  ;;  %607 = vmatprep.subr.bf16.mxu1 %v664_v0  ;;  %v789_v33 = vld [vmem:[%s897_s2] ss:$0 sm:$0xff] }
   0xe   :  { %252 = vmatpush1.bf16.msra.mxu0 %v626_v4  ;;  %616 = vmatpush1.bf16.msra.mxu1 %v626_v4 }
   0xf   :  { %253 = vmatprep.subr.bf16.mxu0 %v664_v0  ;;  %608 = vmatprep.subr.bf16.mxu1 %v664_v0 }
  0x12   :  { %254 = vmatpush1.bf16.msra.mxu0 %v627_v7  ;;  %617 = vmatpush1.bf16.msra.mxu1 %v627_v7 }
  0x13   :  { %255 = vmatprep.subr.bf16.mxu0 %v664_v0  ;;  %609 = vmatprep.subr.bf16.mxu1 %v664_v0 }
  0x16   :  { %256 = vmatpush1.bf16.msra.mxu0 %v628_v8  ;;  %618 = vmatpush1.bf16.msra.mxu1 %v628_v8 }
  0x17   :  { %257 = vmatprep.subr.bf16.mxu0 %v664_v0  ;;  %610 = vmatprep.subr.bf16.mxu1 %v664_v0 }
  0x1a   :  { %258 = vmatpush1.bf16.msra.mxu0 %v629_v9  ;;  %619 = vmatpush1.bf16.msra.mxu1 %v629_v9 }
  0x1b   :  { %259 = vmatprep.subr.bf16.mxu0 %v664_v0  ;;  %611 = vmatprep.subr.bf16.mxu1 %v664_v0 }
  0x1e   :  { %260 = vmatpush1.bf16.msra.mxu0 %v630_v10  ;;  %620 = vmatpush1.bf16.msra.mxu1 %v630_v10 }
  0x1f   :  { %261 = vmatprep.subr.bf16.mxu0 %v664_v0  ;;  %612 = vmatprep.subr.bf16.mxu1 %v664_v0 }
  0x22   :  { %262 = vmatpush1.bf16.msra.mxu0 %v631_v11  ;;  %621 = vmatpush1.bf16.msra.mxu1 %v631_v11 }
  0x25   :  { %278 = vmatmul.mubr.bf16.vlgmr.msra.gmra.mrb[0].mxu0 %v632_v12  ;;  %326 = vmatmul.mubr.bf16.vlgmr.msra.gmra.mrb[0].mxu1 %v635_v13 }
  0x26   :  { %552 = vmatprep.mubr.msk.bf16.mxu0 %vm211_vm0, %v638_v14  ;;  %558 = vmatprep.mubr.msk.bf16.mxu1 %vm211_vm0, %v641_v15 }
  0x2d   :  { %286 = vmatmul.mubr.bf16.gmra.mrb[4].mxu0 %v640_v16  ;;  %334 = vmatmul.mubr.bf16.gmra.mrb[4].mxu1 %v643_v17 }
  0x2e   :  { %553 = vmatprep.mubr.msk.bf16.mxu0 %vm211_vm0, %v644_v18  ;;  %559 = vmatprep.mubr.msk.bf16.mxu1 %vm211_vm0, %v647_v19 }
  0x35   :  { %294 = vmatmul.mubr.bf16.gmra.mrb[8].mxu0 %v646_v20  ;;  %342 = vmatmul.mubr.bf16.gmra.mrb[8].mxu1 %v649_v21 }
  0x36   :  { %554 = vmatprep.mubr.msk.bf16.mxu0 %vm211_vm0, %v650_v22  ;;  %560 = vmatprep.mubr.msk.bf16.mxu1 %vm211_vm0, %v653_v23 }
  0x3d   :  { %302 = vmatmul.mubr.bf16.gmra.mrb[12].mxu0 %v652_v25  ;;  %350 = vmatmul.mubr.bf16.gmra.mrb[12].mxu1 %v655_v26 }
  0x3e   :  { %555 = vmatprep.mubr.msk.bf16.mxu0 %vm211_vm0, %v656_v27  ;;  %561 = vmatprep.mubr.msk.bf16.mxu1 %vm211_vm0, %v541_v28 }
  0x45   :  { %310 = vmatmul.mubr.bf16.gmra.mrb[16].mxu0 %v658_v29  ;;  %358 = vmatmul.mubr.bf16.gmra.mrb[16].mxu1 %v540_v30 }
  0x46   :  { %556 = vmatprep.mubr.msk.bf16.mxu0 %vm211_vm0, %v660_v31 }
  0x4d   :  { %318 = vmatmul.mubr.bf16.gmra.mrb[20].mxu0 %v663_v32 }
  0xf8   :  { %v279_v34 = vpop.f32.mrb[0].mxu0  ;;  %v327_v35 = vpop.f32.mrb[0].mxu1 }
  0xf9   :  { %v280_v36 = vadd.f32 %v789_v33, %v279_v34  ;;  %v281_v37 = vpop.f32.mrb[1].mxu0  ;;  %v328_v38 = vadd.f32 %v789_v33, %v327_v35  ;;  %v329_v39 = vpop.f32.mrb[1].mxu1 }
  0xfa   :  { %v282_v40 = vpop.f32.mrb[2].mxu0  ;;  %v330_v41 = vpop.f32.mrb[2].mxu1 }
  0xfb   :  { %v365_v42 = vmul.f32 0.01, %v280_v36  ;;  %v283_v43 = vadd.f32 %v789_v33, %v282_v40  ;;  %v284_v44 = vpop.f32.mrb[3].mxu0  ;;  %v377_v45 = vmul.f32 0.01, %v328_v38  ;;  %v331_v46 = vadd.f32 %v789_v33, %v330_v41  ;;  %v332_v47 = vpop.f32.mrb[3].mxu1 }
  0xfd   :  { %v386_v48 = vmax.f32 %v280_v36, %v365_v42  ;;  %v366_v49 = vmul.f32 0.01, %v283_v43  ;;  %v398_v50 = vmax.f32 %v328_v38, %v377_v45  ;;  %v378_v51 = vmul.f32 0.01, %v331_v46 }
  0xff   :  { %v583_v52 = vpack.c.bf16 %v386_v48, %v386_v48  ;;  %v387_v53 = vmax.f32 %v283_v43, %v366_v49  ;;  %v595_v54 = vpack.c.bf16 %v398_v50, %v398_v50  ;;  %v399_v55 = vmax.f32 %v331_v46, %v378_v51 }
 0x100   :  { %v287_v56 = vpop.f32.mrb[4].mxu0  ;;  %v335_v57 = vpop.f32.mrb[4].mxu1 }
 0x101   :  { %493 = vst.msk [vmem:[%s898_s3] sm:$0xf] %vm492_vm1, %v583_v52  ;;  %v584_v58 = vpack.c.bf16 %v387_v53, %v387_v53  ;;  %505 = vst.msk [vmem:[%s898_s3 + $0x30] sm:$0xf] %vm492_vm1, %v595_v54  ;;  %v288_v59 = vadd.f32 %v789_v33, %v287_v56  ;;  %v596_v60 = vpack.c.bf16 %v399_v55, %v399_v55  ;;  %v289_v61 = vpop.f32.mrb[5].mxu0  ;;  %v337_v63 = vpop.f32.mrb[5].mxu1 }
 0x102   :  { %v336_v62 = vadd.f32 %v789_v33, %v335_v57  ;;  %v290_v0 = vpop.f32.mrb[6].mxu0  ;;  %v338_v1 = vpop.f32.mrb[6].mxu1 }
 0x103   :  { %494 = vst.msk [vmem:[%s898_s3 + $0x4] sm:$0xf] %vm492_vm1, %v584_v58  ;;  %v367_v2 = vmul.f32 0.01, %v288_v59  ;;  %506 = vst.msk [vmem:[%s898_s3 + $0x34] sm:$0xf] %vm492_vm1, %v596_v60  ;;  %v291_v3 = vadd.f32 %v789_v33, %v290_v0  ;;  %v339_v6 = vadd.f32 %v789_v33, %v338_v1 }
 0x104   :  { %v292_v4 = vpop.f32.mrb[7].mxu0  ;;  %v379_v5 = vmul.f32 0.01, %v336_v62  ;;  %v340_v7 = vpop.f32.mrb[7].mxu1 }
 0x105   :  { %v388_v8 = vmax.f32 %v288_v59, %v367_v2  ;;  %v368_v9 = vmul.f32 0.01, %v291_v3  ;;  %v380_v11 = vmul.f32 0.01, %v339_v6 }
 0x106   :  { %v400_v10 = vmax.f32 %v336_v62, %v379_v5 }
 0x107   :  { %v585_v12 = vpack.c.bf16 %v388_v8, %v388_v8  ;;  %v389_v13 = vmax.f32 %v291_v3, %v368_v9  ;;  %v401_v15 = vmax.f32 %v339_v6, %v380_v11 }
 0x108   :  { %v597_v14 = vpack.c.bf16 %v400_v10, %v400_v10  ;;  %v295_v16 = vpop.f32.mrb[8].mxu0  ;;  %v343_v17 = vpop.f32.mrb[8].mxu1 }
 0x109   :  { %495 = vst.msk [vmem:[%s898_s3 + $0x8] sm:$0xf] %vm492_vm1, %v585_v12  ;;  %v586_v18 = vpack.c.bf16 %v389_v13, %v389_v13  ;;  %v296_v19 = vadd.f32 %v789_v33, %v295_v16  ;;  %v598_v20 = vpack.c.bf16 %v401_v15, %v401_v15  ;;  %v297_v21 = vpop.f32.mrb[9].mxu0  ;;  %v344_v22 = vadd.f32 %v789_v33, %v343_v17  ;;  %v345_v23 = vpop.f32.mrb[9].mxu1 }
 0x10a   :  { %507 = vst.msk [vmem:[%s898_s3 + $0x38] sm:$0xf] %vm492_vm1, %v597_v14  ;;  %v298_v24 = vpop.f32.mrb[10].mxu0  ;;  %v346_v25 = vpop.f32.mrb[10].mxu1 }
 0x10b   :  { %496 = vst.msk [vmem:[%s898_s3 + $0xc] sm:$0xf] %vm492_vm1, %v586_v18  ;;  %v369_v26 = vmul.f32 0.01, %v296_v19  ;;  %508 = vst.msk [vmem:[%s898_s3 + $0x3c] sm:$0xf] %vm492_vm1, %v598_v20  ;;  %v299_v27 = vadd.f32 %v789_v33, %v298_v24  ;;  %v347_v30 = vadd.f32 %v789_v33, %v346_v25 }
 0x10c   :  { %v300_v28 = vpop.f32.mrb[11].mxu0  ;;  %v381_v29 = vmul.f32 0.01, %v344_v22  ;;  %v348_v31 = vpop.f32.mrb[11].mxu1 }
 0x10d   :  { %v390_v32 = vmax.f32 %v296_v19, %v369_v26  ;;  %v370_v34 = vmul.f32 0.01, %v299_v27  ;;  %v382_v36 = vmul.f32 0.01, %v347_v30 }
 0x10e   :  { %v402_v35 = vmax.f32 %v344_v22, %v381_v29 }
 0x10f   :  { %v587_v37 = vpack.c.bf16 %v390_v32, %v390_v32  ;;  %v391_v38 = vmax.f32 %v299_v27, %v370_v34  ;;  %v403_v40 = vmax.f32 %v347_v30, %v382_v36 }
 0x110   :  { %v599_v39 = vpack.c.bf16 %v402_v35, %v402_v35  ;;  %v303_v41 = vpop.f32.mrb[12].mxu0  ;;  %v351_v42 = vpop.f32.mrb[12].mxu1 }
 0x111   :  { %497 = vst.msk [vmem:[%s898_s3 + $0x10] sm:$0xf] %vm492_vm1, %v587_v37  ;;  %v588_v43 = vpack.c.bf16 %v391_v38, %v391_v38  ;;  %v304_v44 = vadd.f32 %v789_v33, %v303_v41  ;;  %v600_v45 = vpack.c.bf16 %v403_v40, %v403_v40  ;;  %v305_v46 = vpop.f32.mrb[13].mxu0  ;;  %v352_v47 = vadd.f32 %v789_v33, %v351_v42  ;;  %v353_v48 = vpop.f32.mrb[13].mxu1 }
 0x112   :  { %509 = vst.msk [vmem:[%s898_s3 + $0x40] sm:$0xf] %vm492_vm1, %v599_v39  ;;  %v306_v49 = vpop.f32.mrb[14].mxu0  ;;  %v354_v50 = vpop.f32.mrb[14].mxu1 }
 0x113   :  { %498 = vst.msk [vmem:[%s898_s3 + $0x14] sm:$0xf] %vm492_vm1, %v588_v43  ;;  %v371_v51 = vmul.f32 0.01, %v304_v44  ;;  %510 = vst.msk [vmem:[%s898_s3 + $0x44] sm:$0xf] %vm492_vm1, %v600_v45  ;;  %v307_v52 = vadd.f32 %v789_v33, %v306_v49  ;;  %v355_v55 = vadd.f32 %v789_v33, %v354_v50 }
 0x114   :  { %v308_v53 = vpop.f32.mrb[15].mxu0  ;;  %v383_v54 = vmul.f32 0.01, %v352_v47  ;;  %v356_v56 = vpop.f32.mrb[15].mxu1 }
 0x115   :  { %v392_v57 = vmax.f32 %v304_v44, %v371_v51  ;;  %v372_v58 = vmul.f32 0.01, %v307_v52  ;;  %v384_v60 = vmul.f32 0.01, %v355_v55 }
 0x116   :  { %v404_v59 = vmax.f32 %v352_v47, %v383_v54 }
 0x117   :  { %v589_v61 = vpack.c.bf16 %v392_v57, %v392_v57  ;;  %v393_v62 = vmax.f32 %v307_v52, %v372_v58  ;;  %v405_v0 = vmax.f32 %v355_v55, %v384_v60 }
 0x118   :  { %v601_v63 = vpack.c.bf16 %v404_v59, %v404_v59  ;;  %v311_v1 = vpop.f32.mrb[16].mxu0  ;;  %v359_v2 = vpop.f32.mrb[16].mxu1 }
 0x119   :  { %499 = vst.msk [vmem:[%s898_s3 + $0x18] sm:$0xf] %vm492_vm1, %v589_v61  ;;  %v590_v3 = vpack.c.bf16 %v393_v62, %v393_v62  ;;  %v312_v4 = vadd.f32 %v789_v33, %v311_v1  ;;  %v602_v5 = vpack.c.bf16 %v405_v0, %v405_v0  ;;  %v313_v6 = vpop.f32.mrb[17].mxu0  ;;  %v360_v7 = vadd.f32 %v789_v33, %v359_v2  ;;  %v361_v8 = vpop.f32.mrb[17].mxu1 }
 0x11a   :  { %511 = vst.msk [vmem:[%s898_s3 + $0x48] sm:$0xf] %vm492_vm1, %v601_v63  ;;  %v314_v9 = vpop.f32.mrb[18].mxu0  ;;  %v362_v10 = vpop.f32.mrb[18].mxu1 }
 0x11b   :  { %500 = vst.msk [vmem:[%s898_s3 + $0x1c] sm:$0xf] %vm492_vm1, %v590_v3  ;;  %v373_v11 = vmul.f32 0.01, %v312_v4  ;;  %512 = vst.msk [vmem:[%s898_s3 + $0x4c] sm:$0xf] %vm492_vm1, %v602_v5  ;;  %v315_v12 = vadd.f32 %v789_v33, %v314_v9 }
 0x11c   :  { %v316_v13 = vpop.f32.mrb[19].mxu0  ;;  %v385_v14 = vmul.f32 0.01, %v360_v7  ;;  %v363_v15 = vpop.f32.mrb[19].mxu1 }
 0x11d   :  { %v394_v16 = vmax.f32 %v312_v4, %v373_v11  ;;  %v374_v17 = vmul.f32 0.01, %v315_v12 }
 0x11e   :  { %v406_v18 = vmax.f32 %v360_v7, %v385_v14 }
 0x11f   :  { %v591_v19 = vpack.c.bf16 %v394_v16, %v394_v16  ;;  %v395_v20 = vmax.f32 %v315_v12, %v374_v17 }
 0x120   :  { %v603_v21 = vpack.c.bf16 %v406_v18, %v406_v18  ;;  %v319_v22 = vpop.f32.mrb[20].mxu0 }
 0x121   :  { %501 = vst.msk [vmem:[%s898_s3 + $0x20] sm:$0xf] %vm492_vm1, %v591_v19  ;;  %v592_v23 = vpack.c.bf16 %v395_v20, %v395_v20  ;;  %v320_v24 = vadd.f32 %v789_v33, %v319_v22  ;;  %v321_v25 = vpop.f32.mrb[21].mxu0 }
 0x122   :  { %514 = vst.msk [vmem:[%s898_s3 + $0x50] sm:$0x1] %vm513_vm2, %v603_v21  ;;  %v322_v26 = vpop.f32.mrb[22].mxu0 }
 0x123   :  { %502 = vst.msk [vmem:[%s898_s3 + $0x24] sm:$0xf] %vm492_vm1, %v592_v23  ;;  %v375_v27 = vmul.f32 0.01, %v320_v24  ;;  %v323_v28 = vadd.f32 %v789_v33, %v322_v26  ;;  %v324_v29 = vpop.f32.mrb[23].mxu0 }
 0x125   :  { %v396_v30 = vmax.f32 %v320_v24, %v375_v27  ;;  %v376_v31 = vmul.f32 0.01, %v323_v28 }
 0x127   :  { %v593_v32 = vpack.c.bf16 %v396_v30, %v396_v30  ;;  %v397_v34 = vmax.f32 %v323_v28, %v376_v31 }
 0x129   :  { %503 = vst.msk [vmem:[%s898_s3 + $0x28] sm:$0xf] %vm492_vm1, %v593_v32  ;;  %v594_v35 = vpack.c.bf16 %v397_v34, %v397_v34 }
 0x12b   :  { %504 = vst.msk [vmem:[%s898_s3 + $0x2c] sm:$0xf] %vm492_vm1, %v594_v35 }

// kernel: dueling_dqn_forward.3
= control target key start
LH: loop header
LB: loop body
LE: loop exit
PB: predicated region body
PF: predicated region fallthrough
CT: control target
= control target key end

     0   :  { %v3010_v34 = vmov 0.0   ;;  %s3726_s0 = inlined_call_operand.vmem [shape: bf16[18,512], index: 0, kind: input, shape index: {}]   ;;  %s3727_s1 = inlined_call_operand.vmem [shape: bf16[512,64], index: 1, kind: input, shape index: {}]   ;;  %s3728_s2 = inlined_call_operand.vmem [shape: f32[1,64], index: 2, kind: input, shape index: {}]   ;;  %s3729_s3 = inlined_call_operand.vmem [shape: bf16[9,64,64], index: 3, kind: input, shape index: {}]   ;;  %s3730_s4 = inlined_call_operand.vmem [shape: f32[1,64], index: 4, kind: input, shape index: {}]   ;;  %s3731_s5 = inlined_call_operand.vmem [shape: bf16[64,1024], index: 5, kind: input, shape index: {}]   ;;  %s3732_s6 = inlined_call_operand.vmem [shape: f32[1,1024], index: 6, kind: input, shape index: {}]   ;;  %s3733_s7 = inlined_call_operand.vmem [shape: bf16[1024,128], index: 7, kind: input, shape index: {}]   ;;  %s3734_s8 = inlined_call_operand.vmem [shape: f32[1,128], index: 8, kind: input, shape index: {}]   ;;  %s3735_s9 = inlined_call_operand.hbm [shape: f32[2,128], index: 9, kind: output, shape index: {}]  }
   0x1   :  { %v2842_v0 = vld [vmem:[%s3727_s1 + $0x40] sm:$0xff]   ;;  %v2846_v4 = vld [vmem:[%s3727_s1 + $0x48] sm:$0xff]   ;;  %v2850_v8 = vld [vmem:[%s3727_s1 + $0x50] sm:$0xff]  }
   0x2   :  { %v2843_v1 = vld [vmem:[%s3727_s1 + $0xc0] sm:$0xff]   ;;  %2539 = vmatprep.subr.bf16.mxu0 %v2842_v0  ;;  %v2847_v5 = vld [vmem:[%s3727_s1 + $0xc8] sm:$0xff]   ;;  %v2851_v9 = vld [vmem:[%s3727_s1 + $0xd0] sm:$0xff]  }
   0x3   :  { %v2844_v2 = vld [vmem:[%s3727_s1] sm:$0xff]   ;;  %2567 = vmatprep.subr.bf16.mxu1 %v2843_v1  ;;  %v2848_v6 = vld [vmem:[%s3727_s1 + $0x8] sm:$0xff]   ;;  %v2852_v10 = vld [vmem:[%s3727_s1 + $0x10] sm:$0xff]  }
   0x4   :  { %v2845_v3 = vld [vmem:[%s3727_s1 + $0x80] sm:$0xff]   ;;  %2540 = vmatpush3.bf16.msra.mxu0 %v2844_v2  ;;  %v2849_v7 = vld [vmem:[%s3727_s1 + $0x88] sm:$0xff]   ;;  %v2853_v11 = vld [vmem:[%s3727_s1 + $0x90] sm:$0xff]  }
   0x5   :  { %2568 = vmatpush3.bf16.msra.mxu1 %v2845_v3  ;;  %2541 = vmatprep.subr.bf16.mxu0 %v2846_v4  ;;  %v2854_v12 = vld [vmem:[%s3727_s1 + $0x58] sm:$0xff]   ;;  %v2858_v16 = vld [vmem:[%s3727_s1 + $0x60] sm:$0xff]   ;;  %v2862_v20 = vld [vmem:[%s3727_s1 + $0x68] sm:$0xff]  }
   0x6   :  { %2569 = vmatprep.subr.bf16.mxu1 %v2847_v5  ;;  %v2855_v13 = vld [vmem:[%s3727_s1 + $0xd8] sm:$0xff]   ;;  %v2859_v17 = vld [vmem:[%s3727_s1 + $0xe0] sm:$0xff]   ;;  %v2863_v21 = vld [vmem:[%s3727_s1 + $0xe8] sm:$0xff]  }
   0x7   :  { %v2856_v14 = vld [vmem:[%s3727_s1 + $0x18] sm:$0xff]   ;;  %v2860_v18 = vld [vmem:[%s3727_s1 + $0x20] sm:$0xff]   ;;  %v2864_v22 = vld [vmem:[%s3727_s1 + $0x28] sm:$0xff]  }
   0x8   :  { %2542 = vmatpush3.bf16.msra.mxu0 %v2848_v6  ;;  %v2857_v15 = vld [vmem:[%s3727_s1 + $0x98] sm:$0xff]   ;;  %v2861_v19 = vld [vmem:[%s3727_s1 + $0xa0] sm:$0xff]   ;;  %v2865_v23 = vld [vmem:[%s3727_s1 + $0xa8] sm:$0xff]  }
   0x9   :  { %2570 = vmatpush3.bf16.msra.mxu1 %v2849_v7  ;;  %2543 = vmatprep.subr.bf16.mxu0 %v2850_v8  ;;  %v2866_v24 = vld [vmem:[%s3727_s1 + $0x70] sm:$0xff]   ;;  %v2870_v28 = vld [vmem:[%s3727_s1 + $0x78] sm:$0xff]   ;;  %v38_v37 = vld [vmem:[%s3726_s0 + $0x20] sm:$0x11] }
   0xa   :  { %2571 = vmatprep.subr.bf16.mxu1 %v2851_v9  ;;  %v2867_v25 = vld [vmem:[%s3727_s1 + $0xf0] sm:$0xff]   ;;  %v2871_v29 = vld [vmem:[%s3727_s1 + $0xf8] sm:$0xff]   ;;  %v2293_v38 = vcombine.high %v38_v37, %v38_v37  ;;  %v39_v39 = vld [vmem:[%s3726_s0 + $0x28] sm:$0x11]  ;;  %v2292_v41 = vcombine.low %v38_v37, %v38_v37 }
   0xb   :  { %v2868_v26 = vld [vmem:[%s3727_s1 + $0x30] sm:$0xff]   ;;  %v2872_v30 = vld [vmem:[%s3727_s1 + $0x38] sm:$0xff]   ;;  %v2295_v40 = vcombine.high %v39_v39, %v39_v39  ;;  %v2294_v42 = vcombine.low %v39_v39, %v39_v39 }
   0xc   :  { %2544 = vmatpush3.bf16.msra.mxu0 %v2852_v10  ;;  %v2869_v27 = vld [vmem:[%s3727_s1 + $0xb0] sm:$0xff]   ;;  %v2873_v31 = vld [vmem:[%s3727_s1 + $0xb8] sm:$0xff]  }
   0xd   :  { %2572 = vmatpush3.bf16.msra.mxu1 %v2853_v11  ;;  %2545 = vmatprep.subr.bf16.mxu0 %v2854_v12  ;;  %v2874_v32 = vld [vmem:[%s3726_s0] ss:$16 sps:$4 sm:$0xff]   ;;  %v2876_v33 = vld [vmem:[%s3726_s0 + $0x4] ss:$16 sps:$4 sm:$0xff]   ;;  %v2877_v35 = vld [vmem:[%s3726_s0 + $0x8] ss:$16 sps:$4 sm:$0xff]  }
   0xe   :  { %2573 = vmatprep.subr.bf16.mxu1 %v2855_v13  ;;  %v2879_v36 = vld [vmem:[%s3726_s0 + $0xc] ss:$16 sps:$4 sm:$0xff]   ;;  %369 = vmatprep.mubr.bf16.mxu0 %v2876_v33 }
   0xf   :  { %417 = vmatprep.mubr.bf16.mxu1 %v2879_v36 }
  0x10   :  { %2546 = vmatpush3.bf16.msra.mxu0 %v2856_v14 }
  0x11   :  { %2574 = vmatpush3.bf16.msra.mxu1 %v2857_v15  ;;  %2547 = vmatprep.subr.bf16.mxu0 %v2858_v16 }
  0x12   :  { %2575 = vmatprep.subr.bf16.mxu1 %v2859_v17 }
  0x14   :  { %2548 = vmatpush3.bf16.msra.mxu0 %v2860_v18 }
  0x15   :  { %2576 = vmatpush3.bf16.msra.mxu1 %v2861_v19  ;;  %2549 = vmatprep.subr.bf16.mxu0 %v2862_v20 }
  0x16   :  { %2577 = vmatprep.subr.bf16.mxu1 %v2863_v21 }
  0x18   :  { %2550 = vmatpush3.bf16.msra.mxu0 %v2864_v22 }
  0x19   :  { %2578 = vmatpush3.bf16.msra.mxu1 %v2865_v23  ;;  %2551 = vmatprep.subr.bf16.mxu0 %v2866_v24 }
  0x1a   :  { %2579 = vmatprep.subr.bf16.mxu1 %v2867_v25 }
  0x1c   :  { %2552 = vmatpush3.bf16.msra.mxu0 %v2868_v26 }
  0x1d   :  { %2580 = vmatpush3.bf16.msra.mxu1 %v2869_v27  ;;  %2553 = vmatprep.subr.bf16.mxu0 %v2870_v28 }
  0x1e   :  { %2581 = vmatprep.subr.bf16.mxu1 %v2871_v29 }
  0x20   :  { %2554 = vmatpush3.bf16.msra.mxu0 %v2872_v30 }
  0x21   :  { %2582 = vmatpush3.bf16.msra.mxu1 %v2873_v31  ;;  %2728 = vmatprep.subr.bf16.mxu0 %v3010_v34 }
  0x22   :  { %2740 = vmatprep.subr.bf16.mxu1 %v3010_v34 }
  0x23   :  { %370 = vmatmul.mubr.bf16.vlgmr.msra.gmra.mrb[0].mxu0 %v2874_v32 }
  0x24   :  { %418 = vmatmul.mubr.bf16.vlgmr.msra.gmra.mrb[0].mxu1 %v2877_v35  ;;  %377 = vmatprep.mubr.bf16.mxu0 %v2293_v38 }
  0x25   :  { %425 = vmatprep.mubr.bf16.mxu1 %v2295_v40 }
  0x2b   :  { %378 = vmatmul.mubr.bf16.gmra.mrb[4].mxu0 %v2292_v41 }
  0x2c   :  { %426 = vmatmul.mubr.bf16.gmra.mrb[4].mxu1 %v2294_v42 }
  0x2d   :  { %14 = vsyncpa [#allocation3], 0  ;;  %v2884_v43 = vld [vmem:[%s3729_s3] sm:$0xff]   ;;  %v2886_v45 = vld [vmem:[%s3729_s3 + $0x8] sm:$0xff]   ;;  %vm3011_vm0 = vmmov 0   ;;  %vm484_vm1 = vcmask 523264  }
  0x2e   :  { %2741 = vmatpush3.bf16.msra.mxu1 %v2884_v43  ;;  %v2885_v44 = vld [vmem:[%s3729_s3 + $0x20] sm:$0xff]   ;;  %v2887_v46 = vld [vmem:[%s3729_s3 + $0x28] sm:$0xff]   ;;  %v2888_v47 = vld [vmem:[%s3729_s3 + $0x10] sm:$0xff]   ;;  %2748 = vmatprep.mubr.msk.bf16.mxu1 %vm3011_vm0, %v3010_v34  ;;  %vm2259_vm2 = vcmask 50176  }
  0x2f   :  { %2742 = vmatprep.subr.bf16.mxu1 %v3010_v34  ;;  %2729 = vmatpush3.bf16.msra.mxu0 %v2885_v44  ;;  %v2889_v48 = vld [vmem:[%s3729_s3 + $0x30] sm:$0xff]   ;;  %v2890_v49 = vld [vmem:[%s3729_s3 + $0x18] sm:$0xff]   ;;  %v2287_v53 = vld [vmem:[%s3728_s2] ss:$0 sm:$0xff] }
  0x30   :  { %2730 = vmatprep.subr.bf16.mxu0 %v3010_v34  ;;  %v2891_v50 = vld [vmem:[%s3729_s3 + $0x38] sm:$0xff]   ;;  %2736 = vmatprep.mubr.msk.bf16.mxu0 %vm3011_vm0, %v3010_v34  ;;  %v2892_v19 = vld [vmem:[%s3729_s3 + $0x60] sm:$0xff]   ;;  %v2894_v24 = vld [vmem:[%s3729_s3 + $0x68] sm:$0xff]  }
  0x31   :  { %v2893_v22 = vld [vmem:[%s3729_s3 + $0x40] sm:$0xff]   ;;  %v2895_v25 = vld [vmem:[%s3729_s3 + $0x48] sm:$0xff]   ;;  %v2896_v26 = vld [vmem:[%s3729_s3 + $0x70] sm:$0xff]  }
  0x32   :  { %2743 = vmatpush3.bf16.msra.mxu1 %v2886_v45  ;;  %v2897_v27 = vld [vmem:[%s3729_s3 + $0x50] sm:$0xff]   ;;  %v2898_v28 = vld [vmem:[%s3729_s3 + $0x78] sm:$0xff]   ;;  %v2900_v30 = vld [vmem:[%s3729_s3 + $0xa0] sm:$0xff]  }
  0x33   :  { %2744 = vmatprep.subr.bf16.mxu1 %v3010_v34  ;;  %2731 = vmatpush3.bf16.msra.mxu0 %v2887_v46  ;;  %v2899_v29 = vld [vmem:[%s3729_s3 + $0x58] sm:$0xff]   ;;  %v2901_v32 = vld [vmem:[%s3729_s3 + $0x80] sm:$0xff]   ;;  %v2902_v35 = vld [vmem:[%s3729_s3 + $0xa8] sm:$0xff]  }
  0x34   :  { %2732 = vmatprep.subr.bf16.mxu0 %v3010_v34  ;;  %v2903_v36 = vld [vmem:[%s3729_s3 + $0x88] sm:$0xff]   ;;  %v2904_v37 = vld [vmem:[%s3729_s3 + $0xb0] sm:$0xff]   ;;  %v2906_v39 = vld [vmem:[%s3729_s3 + $0xb8] sm:$0xff]  }
  0x35   :  { %v2905_v38 = vld [vmem:[%s3729_s3 + $0x90] sm:$0xff]   ;;  %v2907_v40 = vld [vmem:[%s3729_s3 + $0x98] sm:$0xff]   ;;  %v2908_v41 = vld [vmem:[%s3729_s3 + $0xe0] sm:$0xff]  }
  0x36   :  { %2745 = vmatpush3.bf16.msra.mxu1 %v2888_v47  ;;  %v2909_v43 = vld [vmem:[%s3729_s3 + $0xc0] sm:$0xff]   ;;  %v2910_v45 = vld [vmem:[%s3729_s3 + $0xe8] sm:$0xff]   ;;  %v2912_v47 = vld [vmem:[%s3729_s3 + $0xf0] sm:$0xff]  }
  0x37   :  { %2746 = vmatprep.subr.bf16.mxu1 %v3010_v34  ;;  %2733 = vmatpush3.bf16.msra.mxu0 %v2889_v48  ;;  %v2911_v46 = vld [vmem:[%s3729_s3 + $0xc8] sm:$0xff]   ;;  %v2913_v48 = vld [vmem:[%s3729_s3 + $0xd0] sm:$0xff]  }
  0x38   :  { %2734 = vmatprep.subr.bf16.mxu0 %v3010_v34 }
  0x3a   :  { %2747 = vmatpush3.bf16.msra.mxu1 %v2890_v49  ;;  %v2914_v49 = vld [vmem:[%s3729_s3 + $0xf8] sm:$0xff]  }
  0x3b   :  { %2764 = vmatprep.subr.bf16.mxu1 %v3010_v34  ;;  %2735 = vmatpush3.bf16.msra.mxu0 %v2891_v50  ;;  %v2915_v50 = vld [vmem:[%s3729_s3 + $0xd8] sm:$0xff]  }
  0x3c   :  { %2752 = vmatprep.subr.bf16.mxu0 %v3010_v34 }
  0xf6   :  { %v2555_v51 = vpop.f32.mrb[0].mxu0 }
  0xf7   :  { %v2583_v52 = vpop.f32.mrb[0].mxu1  ;;  %v2556_v54 = vpop.f32.mrb[1].mxu0 }
  0xf8   :  { %v2557_v55 = vadd.f32 %v2556_v54, %v2555_v51  ;;  %v2584_v56 = vpop.f32.mrb[1].mxu1  ;;  %v2558_v57 = vpop.f32.mrb[2].mxu0  ;;  %v2917_v54 = vld [vmem:[%s3729_s3 + $0x108] sm:$0xff]  }
  0xf9   :  { %v2585_v58 = vadd.f32 %v2584_v56, %v2583_v52  ;;  %v2586_v59 = vpop.f32.mrb[2].mxu1  ;;  %v2559_v60 = vpop.f32.mrb[3].mxu0  ;;  %v2916_v52 = vld [vmem:[%s3729_s3 + $0x100] sm:$0xff]  }
  0xfa   :  { %v372_v61 = vadd.f32 %v2557_v55, %v2287_v53  ;;  %v2560_v62 = vadd.f32 %v2559_v60, %v2558_v57  ;;  %v2587_v63 = vpop.f32.mrb[3].mxu1  ;;  %v2918_v55 = vld [vmem:[%s3729_s3 + $0x110] sm:$0xff]   ;;  %v2919_v57 = vld [vmem:[%s3729_s3 + $0x118] sm:$0xff]   ;;  %v1151_v60 = vld [vmem:[%s3731_s5] sm:$0xff] }
  0xfb   :  { %v2588_v0 = vadd.f32 %v2587_v63, %v2586_v59 }
  0xfc   :  { %v420_v1 = vadd.f32 %v2585_v58, %v372_v61  ;;  %v375_v2 = vadd.f32 %v2560_v62, %v2287_v53  ;;  %v1155_v61 = vld [vmem:[%s3731_s5 + $0x20] sm:$0xff]  ;;  %v1152_v62 = vld [vmem:[%s3731_s5 + $0x8] sm:$0xff] }
  0xfd   :  { %v2438_v63 = vcombine.low %v1151_v60, %v1155_v61 }
  0xfe   :  { %v433_v3 = vmul.f32 0.01, %v420_v1  ;;  %v423_v4 = vadd.f32 %v2588_v0, %v375_v2  ;;  %v2561_v5 = vpop.f32.mrb[4].mxu0  ;;  %v2439_v0 = vcombine.high %v1151_v60, %v1155_v61  ;;  %v1163_v2 = vld [vmem:[%s3731_s5 + $0x60] sm:$0xff] }
  0xff   :  { %v2562_v6 = vpop.f32.mrb[5].mxu0  ;;  %v2589_v7 = vpop.f32.mrb[4].mxu1 }
 0x100   :  { %v434_v8 = vmul.f32 0.01, %v423_v4  ;;  %v2563_v9 = vadd.f32 %v2562_v6, %v2561_v5  ;;  %v2564_v10 = vpop.f32.mrb[6].mxu0  ;;  %v2590_v11 = vpop.f32.mrb[5].mxu1  ;;  %v436_v15 = vmax.f32 %v420_v1, %v433_v3  ;;  %v1159_v1 = vld [vmem:[%s3731_s5 + $0x40] sm:$0xff]  ;;  %v1160_v6 = vld [vmem:[%s3731_s5 + $0x48] sm:$0xff] }
 0x101   :  { %v2565_v12 = vpop.f32.mrb[7].mxu0  ;;  %v2591_v13 = vadd.f32 %v2590_v11, %v2589_v7  ;;  %v2592_v14 = vpop.f32.mrb[6].mxu1  ;;  %v2447_v5 = vcombine.high %v1159_v1, %v1163_v2  ;;  %v1164_v7 = vld [vmem:[%s3731_s5 + $0x68] sm:$0xff]  ;;  %v1167_v11 = vld [vmem:[%s3731_s5 + $0x80] sm:$0xff] }
 0x102   :  { %v437_v16 = vmax.f32 %v423_v4, %v434_v8  ;;  %v380_v17 = vadd.f32 %v2563_v9, %v2287_v53  ;;  %v2593_v18 = vpop.f32.mrb[7].mxu1  ;;  %v2449_v8 = vcombine.high %v1160_v6, %v1164_v7  ;;  %v2446_v9 = vcombine.low %v1159_v1, %v1163_v2  ;;  %v1171_v12 = vld [vmem:[%s3731_s5 + $0xa0] sm:$0xff] }
 0x103   :  { %v2448_v10 = vcombine.low %v1160_v6, %v1164_v7  ;;  %v2455_v14 = vcombine.high %v1167_v11, %v1171_v12 }
 0x104   :  { %v3223_v20 = vpack.c.bf16 %v437_v16, %v436_v15  ;;  %v3225_v21 = vadd.f32 %v2591_v13, %v380_v17  ;;  %v1168_v13 = vld [vmem:[%s3731_s5 + $0x88] sm:$0xff]  ;;  %v2454_v16 = vcombine.low %v1167_v11, %v1171_v12  ;;  %v2437_v12 = vld [vmem:[%s3730_s4] ss:$0 sm:$0xff] }
 0x105   :  { %v1172_v15 = vld [vmem:[%s3731_s5 + $0xa8] sm:$0xff] }
 0x106   :  { %2749 = vmatmul.mubr.msk.bf16.vlgmr.msra.gmra.mrb[8].mxu1 %vm484_vm1, %v3223_v20  ;;  %v459_v23 = vrot.slane %v3223_v20, 1  ;;  %v682_v31 = vrot.slane %v3223_v20, 3  ;;  %v604_v33 = vrot.slane %v3223_v20, 2  ;;  %v838_v42 = vrot.slane %v3223_v20, 5 }
 0x107   :  { %2765 = vmatpush3.bf16.msra.mxu1 %v2892_v19  ;;  %2772 = vmatprep.mubr.msk.bf16.mxu1 %vm3011_vm0, %v3010_v34  ;;  %v760_v44 = vrot.slane %v3223_v20, 4  ;;  %v994_v51 = vrot.slane %v3223_v20, 7  ;;  %v916_v53 = vrot.slane %v3223_v20, 6  ;;  %v435_v56 = vmul.f32 0.01, %v3225_v21  ;;  %v1175_v19 = vld [vmem:[%s3731_s5 + $0xc0] sm:$0xff] }
 0x108   :  { %2737 = vmatmul.mubr.msk.bf16.vlgmr.msra.gmra.mrb[8].mxu0 %vm484_vm1, %v459_v23  ;;  %2766 = vmatprep.subr.bf16.mxu1 %v3010_v34  ;;  %v2456_v17 = vcombine.low %v1168_v13, %v1172_v15  ;;  %v2457_v18 = vcombine.high %v1168_v13, %v1172_v15  ;;  %v1179_v20 = vld [vmem:[%s3731_s5 + $0xe0] sm:$0xff]  ;;  %v1180_v23 = vld [vmem:[%s3731_s5 + $0xe8] sm:$0xff] }
 0x109   :  { %2753 = vmatpush3.bf16.msra.mxu0 %v2893_v22  ;;  %2760 = vmatprep.mubr.msk.bf16.mxu0 %vm3011_vm0, %v3010_v34  ;;  %v438_v58 = vmax.f32 %v3225_v21, %v435_v56  ;;  %v1176_v21 = vld [vmem:[%s3731_s5 + $0xc8] sm:$0xff]  ;;  %v2463_v22 = vcombine.high %v1175_v19, %v1179_v20 }
 0x10a   :  { %2754 = vmatprep.subr.bf16.mxu0 %v3010_v34 }
 0x10b   :  { %2767 = vmatpush3.bf16.msra.mxu1 %v2894_v24  ;;  %v440_v59 = vpack.c.bf16 %v438_v58, %v438_v58  ;;  %v2462_v24 = vcombine.low %v1175_v19, %v1179_v20  ;;  %v1161_v19 = vld [vmem:[%s3731_s5 + $0x50] sm:$0xff] }
 0x10c   :  { %2768 = vmatprep.subr.bf16.mxu1 %v3010_v34  ;;  %v1165_v20 = vld [vmem:[%s3731_s5 + $0x70] sm:$0xff] }
 0x10d   :  { %2755 = vmatpush3.bf16.msra.mxu0 %v2895_v25  ;;  %v2464_v25 = vcombine.low %v1176_v21, %v1180_v23 }
 0x10e   :  { %2756 = vmatprep.subr.bf16.mxu0 %v3010_v34 }
 0x10f   :  { %2769 = vmatpush3.bf16.msra.mxu1 %v2896_v26  ;;  %v2465_v26 = vcombine.high %v1176_v21, %v1180_v23  ;;  %v1162_v21 = vld [vmem:[%s3731_s5 + $0x58] sm:$0xff] }
 0x110   :  { %2770 = vmatprep.subr.bf16.mxu1 %v3010_v34 }
 0x111   :  { %2757 = vmatpush3.bf16.msra.mxu0 %v2897_v27  ;;  %v3418_v27 = vld [vmem:[%s3731_s5 + $0x10] sm:$0xff] }
 0x112   :  { %2758 = vmatprep.subr.bf16.mxu0 %v3010_v34 }
 0x113   :  { %2771 = vmatpush3.bf16.msra.mxu1 %v2898_v28  ;;  %v3423_v28 = vld [vmem:[%s3731_s5 + $0x30] sm:$0xff] }
 0x114   :  { %2788 = vmatprep.subr.bf16.mxu1 %v3010_v34 }
 0x115   :  { %2759 = vmatpush3.bf16.msra.mxu0 %v2899_v29  ;;  %v3428_v29 = vld [vmem:[%s3731_s5 + $0x18] sm:$0xff] }
 0x116   :  { %2773 = vmatmul.mubr.msk.bf16.vlgmr.msra.gmra.mrb[12].mxu1 %vm484_vm1, %v682_v31  ;;  %2776 = vmatprep.subr.bf16.mxu0 %v3010_v34  ;;  %v3435_v31 = vld [vmem:[%s3731_s5 + $0x38] sm:$0xff] }
 0x117   :  { %2789 = vmatpush3.bf16.msra.mxu1 %v2900_v30  ;;  %2796 = vmatprep.mubr.msk.bf16.mxu1 %vm3011_vm0, %v3010_v34  ;;  %v2443_v30 = vcombine.high %v3418_v27, %v3423_v28 }
 0x118   :  { %2761 = vmatmul.mubr.msk.bf16.vlgmr.msra.gmra.mrb[12].mxu0 %vm484_vm1, %v604_v33  ;;  %2790 = vmatprep.subr.bf16.mxu1 %v3010_v34  ;;  %v2444_v33 = vcombine.low %v3428_v29, %v3435_v31 }
 0x119   :  { %2777 = vmatpush3.bf16.msra.mxu0 %v2901_v32  ;;  %2784 = vmatprep.mubr.msk.bf16.mxu0 %vm3011_vm0, %v3010_v34  ;;  %v2442_v32 = vcombine.low %v3418_v27, %v3423_v28  ;;  %v1178_v27 = vld [vmem:[%s3731_s5 + $0xd8] sm:$0xff] }
 0x11a   :  { %2778 = vmatprep.subr.bf16.mxu0 %v3010_v34  ;;  %v1182_v28 = vld [vmem:[%s3731_s5 + $0xf8] sm:$0xff] }
 0x11b   :  { %2791 = vmatpush3.bf16.msra.mxu1 %v2902_v35  ;;  %v2445_v35 = vcombine.high %v3428_v29, %v3435_v31 }
 0x11c   :  { %2792 = vmatprep.subr.bf16.mxu1 %v3010_v34 }
 0x11d   :  { %2779 = vmatpush3.bf16.msra.mxu0 %v2903_v36  ;;  %v3012_v36 = vmov 0  }
 0x11e   :  { %2780 = vmatprep.subr.bf16.mxu0 %v3010_v34 }
 0x11f   :  { %2793 = vmatpush3.bf16.msra.mxu1 %v2904_v37 }
 0x120   :  { %2794 = vmatprep.subr.bf16.mxu1 %v3010_v34 }
 0x121   :  { %2781 = vmatpush3.bf16.msra.mxu0 %v2905_v38 }
 0x122   :  { %2782 = vmatprep.subr.bf16.mxu0 %v3010_v34 }
 0x123   :  { %2795 = vmatpush3.bf16.msra.mxu1 %v2906_v39 }
 0x124   :  { %2812 = vmatprep.subr.bf16.mxu1 %v3010_v34 }
 0x125   :  { %2783 = vmatpush3.bf16.msra.mxu0 %v2907_v40 }
 0x126   :  { %2797 = vmatmul.mubr.msk.bf16.vlgmr.msra.gmra.mrb[16].mxu1 %vm484_vm1, %v838_v42  ;;  %2800 = vmatprep.subr.bf16.mxu0 %v3010_v34 }
 0x127   :  { %2813 = vmatpush3.bf16.msra.mxu1 %v2908_v41  ;;  %2820 = vmatprep.mubr.msk.bf16.mxu1 %vm3011_vm0, %v3010_v34 }
 0x128   :  { %2785 = vmatmul.mubr.msk.bf16.vlgmr.msra.gmra.mrb[16].mxu0 %vm484_vm1, %v760_v44  ;;  %2814 = vmatprep.subr.bf16.mxu1 %v3010_v34 }
 0x129   :  { %2801 = vmatpush3.bf16.msra.mxu0 %v2909_v43  ;;  %2808 = vmatprep.mubr.msk.bf16.mxu0 %vm3011_vm0, %v3010_v34 }
 0x12a   :  { %2802 = vmatprep.subr.bf16.mxu0 %v3010_v34 }
 0x12b   :  { %2815 = vmatpush3.bf16.msra.mxu1 %v2910_v45 }
 0x12c   :  { %2816 = vmatprep.subr.bf16.mxu1 %v3010_v34 }
 0x12d   :  { %2803 = vmatpush3.bf16.msra.mxu0 %v2911_v46 }
 0x12e   :  { %2804 = vmatprep.subr.bf16.mxu0 %v3010_v34 }
 0x12f   :  { %2817 = vmatpush3.bf16.msra.mxu1 %v2912_v47 }
 0x130   :  { %2818 = vmatprep.subr.bf16.mxu1 %v3010_v34 }
 0x131   :  { %2805 = vmatpush3.bf16.msra.mxu0 %v2913_v48 }
 0x132   :  { %2806 = vmatprep.subr.bf16.mxu0 %v3010_v34 }
 0x133   :  { %2819 = vmatpush3.bf16.msra.mxu1 %v2914_v49 }
 0x134   :  { %1388 = vmatprep.subr.bf16.mxu1 %v2439_v0 }
 0x135   :  { %2807 = vmatpush3.bf16.msra.mxu0 %v2915_v50 }
 0x136   :  { %2821 = vmatmul.mubr.msk.bf16.vlgmr.msra.gmra.mrb[20].mxu1 %vm484_vm1, %v994_v51  ;;  %2824 = vmatprep.subr.bf16.mxu0 %v3010_v34 }
 0x137   :  { %1389 = vmatpush1.bf16.msra.mxu1 %v2438_v63  ;;  %1420 = vmatprep.mubr.bf16.mxu1 %v3012_v36 }
 0x138   :  { %2809 = vmatmul.mubr.msk.bf16.vlgmr.msra.gmra.mrb[20].mxu0 %vm484_vm1, %v916_v53  ;;  %1390 = vmatprep.subr.bf16.mxu1 %v2447_v5 }
 0x139   :  { %2825 = vmatpush3.bf16.msra.mxu0 %v2916_v52  ;;  %2832 = vmatprep.mubr.msk.bf16.mxu0 %vm3011_vm0, %v3010_v34 }
 0x13a   :  { %2826 = vmatprep.subr.bf16.mxu0 %v3010_v34 }
 0x13b   :  { %1391 = vmatpush1.bf16.msra.mxu1 %v2446_v9 }
 0x13c   :  { %1392 = vmatprep.subr.bf16.mxu1 %v2455_v14 }
 0x13d   :  { %2827 = vmatpush3.bf16.msra.mxu0 %v2917_v54 }
 0x13e   :  { %2828 = vmatprep.subr.bf16.mxu0 %v3010_v34 }
 0x13f   :  { %1393 = vmatpush1.bf16.msra.mxu1 %v2454_v16 }
 0x140   :  { %1394 = vmatprep.subr.bf16.mxu1 %v2463_v22  ;;  %v1166_v22 = vld [vmem:[%s3731_s5 + $0x78] sm:$0xff] }
 0x141   :  { %2829 = vmatpush3.bf16.msra.mxu0 %v2918_v55 }
 0x142   :  { %2830 = vmatprep.subr.bf16.mxu0 %v3010_v34  ;;  %v1156_v34 = vld [vmem:[%s3731_s5 + $0x28] sm:$0xff] }
 0x143   :  { %v2440_v3 = vcombine.low %v1152_v62, %v1156_v34  ;;  %v2441_v4 = vcombine.high %v1152_v62, %v1156_v34  ;;  %1395 = vmatpush1.bf16.msra.mxu1 %v2462_v24 }
 0x144   :  { %1470 = vmatprep.subr.bf16.mxu1 %v2443_v30  ;;  %v1169_v30 = vld [vmem:[%s3731_s5 + $0x90] sm:$0xff] }
 0x145   :  { %2831 = vmatpush3.bf16.msra.mxu0 %v2919_v57 }
 0x146   :  { %1429 = vmatprep.subr.bf16.mxu0 %v2441_v4 }
 0x148   :  { %2833 = vmatmul.mubr.msk.bf16.vlgmr.msra.gmra.mrb[24].mxu0 %vm484_vm1, %v440_v59 }
 0x149   :  { %1430 = vmatpush1.bf16.msra.mxu0 %v2440_v3  ;;  %1461 = vmatprep.mubr.bf16.mxu0 %v3012_v36 }
 0x14a   :  { %1431 = vmatprep.subr.bf16.mxu0 %v2449_v8 }
 0x14d   :  { %1432 = vmatpush1.bf16.msra.mxu0 %v2448_v10 }
 0x14e   :  { %1433 = vmatprep.subr.bf16.mxu0 %v2457_v18 }
 0x151   :  { %1434 = vmatpush1.bf16.msra.mxu0 %v2456_v17 }
 0x152   :  { %1435 = vmatprep.subr.bf16.mxu0 %v2465_v26  ;;  %v2453_v26 = vcombine.high %v1162_v21, %v1166_v22 }
 0x155   :  { %1436 = vmatpush1.bf16.msra.mxu0 %v2464_v25  ;;  %v2451_v25 = vcombine.high %v1161_v19, %v1165_v20 }
 0x156   :  { %1511 = vmatprep.subr.bf16.mxu0 %v2445_v35  ;;  %v1173_v35 = vld [vmem:[%s3731_s5 + $0xb0] sm:$0xff] }
 0x157   :  { %v2458_v29 = vcombine.low %v1169_v30, %v1173_v35 }
 0x1d9   :  { %v589_v37 = vpop.f32.mrb[8].mxu1 }
 0x1da   :  { %v2750_v38 = vpop.f32.mrb[9].mxu1 }
 0x1db   :  { %v522_v39 = vpop.f32.mrb[8].mxu0  ;;  %v592_v40 = vpop.f32.mrb[10].mxu1  ;;  %v1174_v38 = vld [vmem:[%s3731_s5 + $0xb8] sm:$0xff] }
 0x1dc   :  { %v590_v41 = vadd.f32 %v589_v37, %v522_v39  ;;  %v2738_v42 = vpop.f32.mrb[9].mxu0  ;;  %v2751_v43 = vpop.f32.mrb[11].mxu1  ;;  %v1170_v37 = vld [vmem:[%s3731_s5 + $0x98] sm:$0xff]  ;;  %v2450_v39 = vcombine.low %v1161_v19, %v1165_v20  ;;  %v2452_v40 = vcombine.low %v1162_v21, %v1166_v22  ;;  %v3605_v19 = vld [vmem:[%s3732_s6] sm:$0xff] }
 0x1dd   :  { %v525_v44 = vpop.f32.mrb[10].mxu0  ;;  %v2461_v42 = vcombine.high %v1170_v37, %v1174_v38  ;;  %v1177_v43 = vld [vmem:[%s3731_s5 + $0xd0] sm:$0xff]  ;;  %v2460_v31 = vcombine.low %v1170_v37, %v1174_v38 }
 0x1de   :  { %v2739_v45 = vpop.f32.mrb[11].mxu0  ;;  %v1181_v44 = vld [vmem:[%s3731_s5 + $0xf0] sm:$0xff] }
 0x1df   :  { %v2466_v45 = vcombine.low %v1177_v43, %v1181_v44 }
 0x1e9   :  { %v744_v46 = vpop.f32.mrb[12].mxu1 }
 0x1ea   :  { %v2774_v47 = vpop.f32.mrb[13].mxu1 }
 0x1eb   :  { %v666_v48 = vpop.f32.mrb[12].mxu0  ;;  %v747_v49 = vpop.f32.mrb[14].mxu1  ;;  %v2920_v47 = vld [vmem:[%s3733_s7 + $0x40] sm:$0xff]  }
 0x1ec   :  { %v672_v50 = vadd.f32 %v666_v48, %v590_v41  ;;  %v2762_v51 = vpop.f32.mrb[13].mxu0  ;;  %v2775_v52 = vpop.f32.mrb[15].mxu1  ;;  %v2459_v41 = vcombine.high %v1169_v30, %v1173_v35  ;;  %v2922_v48 = vld [vmem:[%s3733_s7] sm:$0xff]  }
 0x1ed   :  { %v669_v53 = vpop.f32.mrb[14].mxu0  ;;  %v2923_v49 = vld [vmem:[%s3733_s7 + $0x80] sm:$0xff]   ;;  %v2925_v51 = vld [vmem:[%s3733_s7 + $0xc8] sm:$0xff]  }
 0x1ee   :  { %v2763_v54 = vpop.f32.mrb[15].mxu0  ;;  %v750_v55 = vadd.f32 %v744_v46, %v672_v50  ;;  %v2468_v46 = vcombine.low %v1178_v27, %v1182_v28  ;;  %v2924_v50 = vld [vmem:[%s3733_s7 + $0x48] sm:$0xff]  }
 0x1ef   :  { %v2926_v52 = vld [vmem:[%s3733_s7 + $0x8] sm:$0xff]   ;;  %v2928_v54 = vld [vmem:[%s3733_s7 + $0x50] sm:$0xff]  }
 0x1f0   :  { %v2927_v53 = vld [vmem:[%s3733_s7 + $0x88] sm:$0xff]  }
 0x1f9   :  { %v900_v56 = vpop.f32.mrb[16].mxu1 }
 0x1fa   :  { %v2798_v57 = vpop.f32.mrb[17].mxu1 }
 0x1fb   :  { %v822_v58 = vpop.f32.mrb[16].mxu0  ;;  %v903_v59 = vpop.f32.mrb[18].mxu1  ;;  %v2931_v57 = vld [vmem:[%s3733_s7 + $0x90] sm:$0xff]  }
 0x1fc   :  { %v828_v60 = vadd.f32 %v822_v58, %v750_v55  ;;  %v2786_v61 = vpop.f32.mrb[17].mxu0  ;;  %v2799_v62 = vpop.f32.mrb[19].mxu1  ;;  %v2929_v55 = vld [vmem:[%s3733_s7 + $0xd0] sm:$0xff]   ;;  %v2932_v58 = vld [vmem:[%s3733_s7 + $0x58] sm:$0xff]  }
 0x1fd   :  { %v825_v63 = vpop.f32.mrb[18].mxu0  ;;  %v2933_v59 = vld [vmem:[%s3733_s7 + $0xd8] sm:$0xff]   ;;  %v2936_v62 = vld [vmem:[%s3733_s7 + $0x60] sm:$0xff]  }
 0x1fe   :  { %v2787_v0 = vpop.f32.mrb[19].mxu0  ;;  %v906_v34 = vadd.f32 %v900_v56, %v828_v60  ;;  %v2930_v56 = vld [vmem:[%s3733_s7 + $0x10] sm:$0xff]   ;;  %v2934_v60 = vld [vmem:[%s3733_s7 + $0x18] sm:$0xff]   ;;  %v2937_v63 = vld [vmem:[%s3733_s7 + $0xe0] sm:$0xff]  }
 0x1ff   :  { %v2935_v61 = vld [vmem:[%s3733_s7 + $0x98] sm:$0xff]   ;;  %v2938_v0 = vld [vmem:[%s3733_s7 + $0x20] sm:$0xff]  }
 0x209   :  { %v1056_v1 = vpop.f32.mrb[20].mxu1 }
 0x20a   :  { %v2822_v2 = vpop.f32.mrb[21].mxu1 }
 0x20b   :  { %v978_v3 = vpop.f32.mrb[20].mxu0  ;;  %v1059_v4 = vpop.f32.mrb[22].mxu1  ;;  %v2941_v2 = vld [vmem:[%s3733_s7 + $0xe8] sm:$0xff]  }
 0x20c   :  { %v984_v5 = vadd.f32 %v978_v3, %v906_v34  ;;  %v2810_v6 = vpop.f32.mrb[21].mxu0  ;;  %v2823_v7 = vpop.f32.mrb[23].mxu1  ;;  %v2939_v34 = vld [vmem:[%s3733_s7 + $0xa0] sm:$0xff]   ;;  %v2942_v3 = vld [vmem:[%s3733_s7 + $0x28] sm:$0xff]  }
 0x20d   :  { %v981_v8 = vpop.f32.mrb[22].mxu0  ;;  %v2943_v4 = vld [vmem:[%s3733_s7 + $0xa8] sm:$0xff]   ;;  %v2945_v6 = vld [vmem:[%s3733_s7 + $0xf0] sm:$0xff]  }
 0x20e   :  { %v2811_v9 = vpop.f32.mrb[23].mxu0  ;;  %v1062_v10 = vadd.f32 %v1056_v1, %v984_v5  ;;  %v2940_v1 = vld [vmem:[%s3733_s7 + $0x68] sm:$0xff]   ;;  %v2944_v5 = vld [vmem:[%s3733_s7 + $0x70] sm:$0xff]  }
 0x20f   :  { %v2946_v7 = vld [vmem:[%s3733_s7 + $0x30] sm:$0xff]   ;;  %v2948_v9 = vld [vmem:[%s3733_s7 + $0x78] sm:$0xff]  }
 0x210   :  { %v2947_v8 = vld [vmem:[%s3733_s7 + $0xb0] sm:$0xff]  }
 0x21b   :  { %v1133_v11 = vpop.f32.mrb[24].mxu0 }
 0x21c   :  { %v1139_v13 = vadd.f32 %v1133_v11, %v1062_v10  ;;  %v2834_v14 = vpop.f32.mrb[25].mxu0  ;;  %v2949_v10 = vld [vmem:[%s3733_s7 + $0xf8] sm:$0xff]  }
 0x21d   :  { %v1136_v15 = vpop.f32.mrb[26].mxu0  ;;  %v2950_v11 = vld [vmem:[%s3733_s7 + $0x38] sm:$0xff]   ;;  %v2953_v14 = vld [vmem:[%s3733_s7 + $0x1c0] sm:$0xff]  }
 0x21e   :  { %v1147_v16 = vadd.f32 %v2437_v12, %v1139_v13  ;;  %v2835_v17 = vpop.f32.mrb[27].mxu0  ;;  %v2951_v12 = vld [vmem:[%s3733_s7 + $0xb8] sm:$0xff]   ;;  %v2952_v13 = vld [vmem:[%s3733_s7 + $0x140] sm:$0xff]   ;;  %v1185_v15 = vlaneseq }
 0x220   :  { %v1148_v18 = vmul.f32 0.01, %v1147_v16 }
 0x222   :  { %v1149_v23 = vmax.f32 %v1147_v16, %v1148_v18  ;;  %v3598_v16 = vshrl.u32 %v1185_v15, 7  ;;  %v2967_v15 = vld [vmem:[%s3733_s7 + $0x198] sm:$0xff]  }
 0x224   :  { %v1150_v24 = vpack.c.bf16 %v1149_v23, %v1149_v23  ;;  %v1187_v17 = vsub.s32 0, %v3598_v16  ;;  %v1195_v18 = vsub.s32 2, %v3598_v16  ;;  %v1191_v20 = vsub.s32 1, %v3598_v16 }
 0x225   :  { %v1199_v21 = vsub.s32 3, %v3598_v16 }
 0x226   :  { %2470 = vmatmul.mubr.msk.bf16.vlgmr.msra.gmra.mrb[24].mxu1 %vm484_vm1, %v1150_v24  ;;  %2471 = vmatmul.mubr.msk.bf16.vlgmr.msra.gmra.mrb[28].mxu0 %vm484_vm1, %v1150_v24  ;;  %v1188_v22 = vrot.slane %v3605_v19, %v1187_v17  ;;  %v1196_v23 = vrot.slane %v3605_v19, %v1195_v18  ;;  %v1203_v17 = vsub.s32 4, %v3598_v16  ;;  %v1211_v18 = vsub.s32 6, %v3598_v16 }
 0x227   :  { %1471 = vmatpush1.bf16.msra.mxu1 %v2442_v32  ;;  %1512 = vmatpush1.bf16.msra.mxu0 %v2444_v33  ;;  %v2467_v32 = vcombine.high %v1177_v43, %v1181_v44  ;;  %v2469_v33 = vcombine.high %v1178_v27, %v1182_v28 }
 0x228   :  { %1472 = vmatprep.subr.bf16.mxu1 %v2451_v25  ;;  %1513 = vmatprep.subr.bf16.mxu0 %v2453_v26  ;;  %v1200_v25 = vrot.slane %v3605_v19, %v1199_v21  ;;  %v2969_v21 = vld [vmem:[%s3733_s7 + $0x1e0] sm:$0xff]  }
 0x229   :  { %1502 = vmatprep.mubr.bf16.mxu1 %v3012_v36  ;;  %1543 = vmatprep.mubr.bf16.mxu0 %v3012_v36  ;;  %v2921_v36 = vld [vmem:[%s3733_s7 + $0xc0] sm:$0xff]  }
 0x22b   :  { %1473 = vmatpush1.bf16.msra.mxu1 %v2450_v39  ;;  %1514 = vmatpush1.bf16.msra.mxu0 %v2452_v40 }
 0x22c   :  { %1474 = vmatprep.subr.bf16.mxu1 %v2459_v41  ;;  %1515 = vmatprep.subr.bf16.mxu0 %v2461_v42 }
 0x22f   :  { %1475 = vmatpush1.bf16.msra.mxu1 %v2458_v29  ;;  %1516 = vmatpush1.bf16.msra.mxu0 %v2460_v31 }
 0x230   :  { %1476 = vmatprep.subr.bf16.mxu1 %v2467_v32  ;;  %1517 = vmatprep.subr.bf16.mxu0 %v2469_v33 }
 0x233   :  { %1477 = vmatpush1.bf16.msra.mxu1 %v2466_v45  ;;  %1518 = vmatpush1.bf16.msra.mxu0 %v2468_v46 }
 0x234   :  { %2640 = vmatprep.subr.bf16.mxu1 %v2920_v47  ;;  %2662 = vmatprep.subr.bf16.mxu0 %v2921_v36 }
 0x236   :  { %2472 = vmatmul.mubr.msk.bf16.vlgmr.msra.gmra.mrb[28].mxu1 %vm484_vm1, %v1150_v24  ;;  %2473 = vmatmul.mubr.msk.bf16.vlgmr.msra.gmra.mrb[32].mxu0 %vm484_vm1, %v1150_v24  ;;  %v1192_v24 = vrot.slane %v3605_v19, %v1191_v20  ;;  %v2968_v20 = vld [vmem:[%s3733_s7 + $0x160] sm:$0xff]  }
 0x237   :  { %2641 = vmatpush3.bf16.msra.mxu1 %v2922_v48  ;;  %2663 = vmatpush3.bf16.msra.mxu0 %v2923_v49  ;;  %v2954_v49 = vld [vmem:[%s3733_s7 + $0x100] sm:$0xff]  }
 0x238   :  { %2642 = vmatprep.subr.bf16.mxu1 %v2924_v50  ;;  %2664 = vmatprep.subr.bf16.mxu0 %v2925_v51  ;;  %v2955_v50 = vld [vmem:[%s3733_s7 + $0x180] sm:$0xff]  }
 0x23b   :  { %2643 = vmatpush3.bf16.msra.mxu1 %v2926_v52  ;;  %2665 = vmatpush3.bf16.msra.mxu0 %v2927_v53  ;;  %v2956_v53 = vld [vmem:[%s3733_s7 + $0x148] sm:$0xff]  }
 0x23c   :  { %2644 = vmatprep.subr.bf16.mxu1 %v2928_v54  ;;  %2666 = vmatprep.subr.bf16.mxu0 %v2929_v55  ;;  %v2957_v54 = vld [vmem:[%s3733_s7 + $0x1c8] sm:$0xff]   ;;  %v1207_v55 = vsub.s32 5, %v3598_v16 }
 0x23f   :  { %2645 = vmatpush3.bf16.msra.mxu1 %v2930_v56  ;;  %2667 = vmatpush3.bf16.msra.mxu0 %v2931_v57  ;;  %v1215_v56 = vsub.s32 7, %v3598_v16  ;;  %v2958_v57 = vld [vmem:[%s3733_s7 + $0x108] sm:$0xff]   ;;  %v2970_v16 = vld [vmem:[%s3733_s7 + $0x120] sm:$0xff]  }
 0x240   :  { %2646 = vmatprep.subr.bf16.mxu1 %v2932_v58  ;;  %2668 = vmatprep.subr.bf16.mxu0 %v2933_v59  ;;  %v2959_v58 = vld [vmem:[%s3733_s7 + $0x188] sm:$0xff]   ;;  %v2960_v59 = vld [vmem:[%s3733_s7 + $0x150] sm:$0xff]  }
 0x243   :  { %2647 = vmatpush3.bf16.msra.mxu1 %v2934_v60  ;;  %2669 = vmatpush3.bf16.msra.mxu0 %v2935_v61  ;;  %v2961_v60 = vld [vmem:[%s3733_s7 + $0x1d0] sm:$0xff]   ;;  %v1208_v61 = vrot.slane %v3605_v19, %v1207_v55 }
 0x244   :  { %2648 = vmatprep.subr.bf16.mxu1 %v2936_v62  ;;  %2670 = vmatprep.subr.bf16.mxu0 %v2937_v63  ;;  %v1216_v62 = vrot.slane %v3605_v19, %v1215_v56 }
 0x247   :  { %2649 = vmatpush3.bf16.msra.mxu1 %v2938_v0  ;;  %2671 = vmatpush3.bf16.msra.mxu0 %v2939_v34  ;;  %v2962_v34 = vld [vmem:[%s3733_s7 + $0x110] sm:$0xff]  }
 0x248   :  { %2650 = vmatprep.subr.bf16.mxu1 %v2940_v1  ;;  %2672 = vmatprep.subr.bf16.mxu0 %v2941_v2  ;;  %v2963_v1 = vld [vmem:[%s3733_s7 + $0x190] sm:$0xff]  }
 0x24b   :  { %2651 = vmatpush3.bf16.msra.mxu1 %v2942_v3  ;;  %2673 = vmatpush3.bf16.msra.mxu0 %v2943_v4  ;;  %v2964_v4 = vld [vmem:[%s3733_s7 + $0x158] sm:$0xff]  }
 0x24c   :  { %2652 = vmatprep.subr.bf16.mxu1 %v2944_v5  ;;  %2674 = vmatprep.subr.bf16.mxu0 %v2945_v6  ;;  %v2965_v5 = vld [vmem:[%s3733_s7 + $0x1d8] sm:$0xff]  }
 0x24f   :  { %2653 = vmatpush3.bf16.msra.mxu1 %v2946_v7  ;;  %2675 = vmatpush3.bf16.msra.mxu0 %v2947_v8 }
 0x250   :  { %2654 = vmatprep.subr.bf16.mxu1 %v2948_v9  ;;  %2676 = vmatprep.subr.bf16.mxu0 %v2949_v10 }
 0x253   :  { %2655 = vmatpush3.bf16.msra.mxu1 %v2950_v11  ;;  %2677 = vmatpush3.bf16.msra.mxu0 %v2951_v12 }
 0x254   :  { %2684 = vmatprep.subr.bf16.mxu1 %v2952_v13  ;;  %2706 = vmatprep.subr.bf16.mxu0 %v2953_v14  ;;  %v2966_v14 = vld [vmem:[%s3733_s7 + $0x118] sm:$0xff]  }
 0x2f9   :  { %v1422_v26 = vpop.f32.mrb[24].mxu1  ;;  %v1463_v30 = vpop.f32.mrb[28].mxu0 }
 0x2fa   :  { %v1423_v35 = vadd.f32 %v1422_v26, %v1188_v22  ;;  %v1464_v37 = vadd.f32 %v1463_v30, %v1196_v23  ;;  %v1424_v38 = vpop.f32.mrb[25].mxu1  ;;  %v1465_v39 = vpop.f32.mrb[29].mxu0  ;;  %v2971_v26 = vld [vmem:[%s3733_s7 + $0x1a0] sm:$0xff]   ;;  %v1204_v30 = vrot.slane %v3605_v19, %v1203_v17 }
 0x2fb   :  { %v1425_v40 = vadd.f32 %v1424_v38, %v1192_v24  ;;  %v1466_v41 = vadd.f32 %v1465_v39, %v1200_v25  ;;  %v1426_v42 = vpop.f32.mrb[26].mxu1  ;;  %v1467_v43 = vpop.f32.mrb[30].mxu0  ;;  %v2973_v38 = vld [vmem:[%s3733_s7 + $0x1e8] sm:$0xff]  }
 0x2fc   :  { %v1552_v44 = vmul.f32 0.01, %v1423_v35  ;;  %v1554_v27 = vmul.f32 0.01, %v1464_v37  ;;  %v1427_v28 = vpop.f32.mrb[27].mxu1  ;;  %v1468_v29 = vpop.f32.mrb[31].mxu0 }
 0x2fd   :  { %v1553_v31 = vmul.f32 0.01, %v1425_v40  ;;  %v1555_v32 = vmul.f32 0.01, %v1466_v41  ;;  %v2974_v39 = vld [vmem:[%s3733_s7 + $0x128] sm:$0xff]   ;;  %v2976_v42 = vld [vmem:[%s3733_s7 + $0x170] sm:$0xff]  }
 0x2fe   :  { %v1560_v33 = vmax.f32 %v1423_v35, %v1552_v44  ;;  %v1562_v45 = vmax.f32 %v1464_v37, %v1554_v27  ;;  %v1212_v35 = vrot.slane %v3605_v19, %v1211_v18  ;;  %v2972_v37 = vld [vmem:[%s3733_s7 + $0x168] sm:$0xff]   ;;  %v2977_v43 = vld [vmem:[%s3733_s7 + $0x1f0] sm:$0xff]  }
 0x2ff   :  { %v1561_v46 = vmax.f32 %v1425_v40, %v1553_v31  ;;  %v1563_v47 = vmax.f32 %v1466_v41, %v1555_v32  ;;  %v2975_v19 = vld [vmem:[%s3733_s7 + $0x1a8] sm:$0xff]   ;;  %v2978_v44 = vld [vmem:[%s3733_s7 + $0x130] sm:$0xff]   ;;  %v2980_v31 = vld [vmem:[%s3733_s7 + $0x178] sm:$0xff]  }
 0x300   :  { %v1568_v51 = vpack.c.bf16 %v1560_v33, %v1560_v33  ;;  %v1570_v52 = vpack.c.bf16 %v1562_v45, %v1562_v45  ;;  %v2979_v27 = vld [vmem:[%s3733_s7 + $0x1b0] sm:$0xff]   ;;  %v2981_v32 = vld [vmem:[%s3733_s7 + $0x1f8] sm:$0xff]  }
 0x301   :  { %v1569_v36 = vpack.c.bf16 %v1561_v46, %v1561_v46  ;;  %v1571_v48 = vpack.c.bf16 %v1563_v47, %v1563_v47  ;;  %v2982_v33 = vld [vmem:[%s3733_s7 + $0x138] sm:$0xff]  }
 0x302   :  { %v2983_v45 = vld [vmem:[%s3733_s7 + $0x1b8] sm:$0xff]   ;;  %s3014_s7 = smov [#allocation2]  }
 0x303   :  { %2127 = vmatprep.mubr.bf16.mxu1 %v1569_v36  ;;  %2167 = vmatprep.mubr.bf16.mxu0 %v1571_v48 }
 0x304   :  { %2128 = vmatmul.mubr.bf16.vlgmr.msra.gmra.mrb[32].mxu1 %v1568_v51  ;;  %2168 = vmatmul.mubr.bf16.vlgmr.msra.gmra.mrb[36].mxu0 %v1570_v52  ;;  %v2474_v52 = vld [vmem:[%s3734_s8] ss:$0 sm:$0xff]  ;;  %s2279_s8 = sshll.u32 %s3014_s7, 4  ;;  %s2280_s8 = int_to_ptr.vmem [resolvable:$true] %s2279_s8 }
 0x305   :  { %2685 = vmatpush3.bf16.msra.mxu1 %v2954_v49  ;;  %2707 = vmatpush3.bf16.msra.mxu0 %v2955_v50  ;;  %v3013_v49 = vmov 7   ;;  %s2986_s30 = scalar_lea.vmem %s2280_s8, 32  ;;  %p2991_p1 = scmp.lt.s32.totalorder %s2280_s8, %s2280_s8 }
 0x306   :  { %2686 = vmatprep.subr.bf16.mxu1 %v2956_v53  ;;  %2708 = vmatprep.subr.bf16.mxu0 %v2957_v54  ;;  %p2987_p0 = scmp.ne.s32.totalorder %s2280_s8, %s2986_s30  ;;  %p2992_p2 = scmp.lt.s32.totalorder %s2986_s30, %s2986_s30 }
 0x307   :  { %2841 = vset.pattern.permute.xlu0 %v3013_v49 }
 0x308   :  { %p2993_p3 = por %p2992_p2, %p2991_p1 }
 0x309   :  { %v1504_v63 = vpop.f32.mrb[28].mxu1  ;;  %v1545_v0 = vpop.f32.mrb[32].mxu0  ;;  %2687 = vmatpush3.bf16.msra.mxu1 %v2958_v57  ;;  %2709 = vmatpush3.bf16.msra.mxu0 %v2959_v58 }
 0x30a   :  { %v1506_v2 = vpop.f32.mrb[29].mxu1  ;;  %v1547_v3 = vpop.f32.mrb[33].mxu0  ;;  %2688 = vmatprep.subr.bf16.mxu1 %v2960_v59  ;;  %2710 = vmatprep.subr.bf16.mxu0 %v2961_v60  ;;  %v1505_v40 = vadd.f32 %v1504_v63, %v1204_v30  ;;  %v1546_v41 = vadd.f32 %v1545_v0, %v1212_v35  ;;  %p2994_p4 = pnand %p2993_p3, %p2987_p0 }
 0x30b   :  { %v1507_v6 = vadd.f32 %v1506_v2, %v1208_v61  ;;  %v1548_v7 = vadd.f32 %v1547_v3, %v1216_v62  ;;  %v1508_v8 = vpop.f32.mrb[30].mxu1  ;;  %v1549_v9 = vpop.f32.mrb[34].mxu0 }
 0x30c   :  { %v1509_v10 = vpop.f32.mrb[31].mxu1  ;;  %v1550_v11 = vpop.f32.mrb[35].mxu0  ;;  %v1556_v28 = vmul.f32 0.01, %v1505_v40  ;;  %v1558_v29 = vmul.f32 0.01, %v1546_v41 }
 0x30d   :  { %v1557_v12 = vmul.f32 0.01, %v1507_v6  ;;  %v1559_v13 = vmul.f32 0.01, %v1548_v7  ;;  %2689 = vmatpush3.bf16.msra.mxu1 %v2962_v34  ;;  %2711 = vmatpush3.bf16.msra.mxu0 %v2963_v1 }
 0x30e   :  { %2690 = vmatprep.subr.bf16.mxu1 %v2964_v4  ;;  %2712 = vmatprep.subr.bf16.mxu0 %v2965_v5  ;;  %v1564_v46 = vmax.f32 %v1505_v40, %v1556_v28  ;;  %v1566_v47 = vmax.f32 %v1546_v41, %v1558_v29 }
 0x30f   :  { %v1565_v22 = vmax.f32 %v1507_v6, %v1557_v12  ;;  %v1567_v23 = vmax.f32 %v1548_v7, %v1559_v13 }
 0x310   :  { %v1572_v36 = vpack.c.bf16 %v1564_v46, %v1564_v46  ;;  %v1574_v48 = vpack.c.bf16 %v1566_v47, %v1566_v47 }
 0x311   :  { %v1573_v24 = vpack.c.bf16 %v1565_v22, %v1565_v22  ;;  %v1575_v25 = vpack.c.bf16 %v1567_v23, %v1567_v23  ;;  %2691 = vmatpush3.bf16.msra.mxu1 %v2966_v14  ;;  %2713 = vmatpush3.bf16.msra.mxu0 %v2967_v15 }
 0x312   :  { %2692 = vmatprep.subr.bf16.mxu1 %v2968_v20  ;;  %2714 = vmatprep.subr.bf16.mxu0 %v2969_v21 }
 0x313   :  { %2207 = vmatprep.mubr.bf16.mxu1 %v1573_v24  ;;  %2247 = vmatprep.mubr.bf16.mxu0 %v1575_v25 }
 0x315   :  { %2693 = vmatpush3.bf16.msra.mxu1 %v2970_v16  ;;  %2715 = vmatpush3.bf16.msra.mxu0 %v2971_v26 }
 0x316   :  { %2694 = vmatprep.subr.bf16.mxu1 %v2972_v37  ;;  %2716 = vmatprep.subr.bf16.mxu0 %v2973_v38 }
 0x319   :  { %2695 = vmatpush3.bf16.msra.mxu1 %v2974_v39  ;;  %2717 = vmatpush3.bf16.msra.mxu0 %v2975_v19 }
 0x31a   :  { %2696 = vmatprep.subr.bf16.mxu1 %v2976_v42  ;;  %2718 = vmatprep.subr.bf16.mxu0 %v2977_v43 }
 0x31d   :  { %2697 = vmatpush3.bf16.msra.mxu1 %v2978_v44  ;;  %2719 = vmatpush3.bf16.msra.mxu0 %v2979_v27 }
 0x31e   :  { %2698 = vmatprep.subr.bf16.mxu1 %v2980_v31  ;;  %2720 = vmatprep.subr.bf16.mxu0 %v2981_v32 }
 0x321   :  { %2699 = vmatpush3.bf16.msra.mxu1 %v2982_v33  ;;  %2721 = vmatpush3.bf16.msra.mxu0 %v2983_v45 }
 0x324   :  { %2208 = vmatmul.mubr.bf16.vlgmr.msra.gmra.mrb[36].mxu1 %v1572_v36  ;;  %2248 = vmatmul.mubr.bf16.vlgmr.msra.gmra.mrb[40].mxu0 %v1574_v48 }
 0x3d7   :  { %v2656_v50 = vpop.f32.mrb[32].mxu1  ;;  %v2678_v51 = vpop.f32.mrb[36].mxu0 }
 0x3d8   :  { %v2657_v53 = vpop.f32.mrb[33].mxu1  ;;  %v2679_v54 = vpop.f32.mrb[37].mxu0 }
 0x3d9   :  { %v2658_v55 = vadd.f32 %v2657_v53, %v2656_v50  ;;  %v2680_v56 = vadd.f32 %v2679_v54, %v2678_v51  ;;  %v2659_v57 = vpop.f32.mrb[34].mxu1  ;;  %v2681_v58 = vpop.f32.mrb[38].mxu0 }
 0x3da   :  { %v2660_v59 = vpop.f32.mrb[35].mxu1  ;;  %v2682_v60 = vpop.f32.mrb[39].mxu0 }
 0x3db   :  { %v2130_v61 = vadd.f32 %v2658_v55, %v2474_v52 }
 0x3dd   :  { %v2170_v62 = vadd.f32 %v2680_v56, %v2130_v61 }
 0x3f7   :  { %v2700_v63 = vpop.f32.mrb[36].mxu1  ;;  %v2722_v0 = vpop.f32.mrb[40].mxu0 }
 0x3f8   :  { %v2701_v34 = vpop.f32.mrb[37].mxu1  ;;  %v2723_v1 = vpop.f32.mrb[41].mxu0 }
 0x3f9   :  { %v2702_v2 = vadd.f32 %v2701_v34, %v2700_v63  ;;  %v2724_v3 = vadd.f32 %v2723_v1, %v2722_v0  ;;  %v2703_v4 = vpop.f32.mrb[38].mxu1  ;;  %v2725_v5 = vpop.f32.mrb[42].mxu0 }
 0x3fa   :  { %v2704_v6 = vpop.f32.mrb[39].mxu1  ;;  %v2726_v7 = vpop.f32.mrb[43].mxu0 }
 0x3fb   :  { %v2210_v8 = vadd.f32 %v2702_v2, %v2170_v62 }
 0x3fd   :  { %v2250_v9 = vadd.f32 %v2724_v3, %v2210_v8 }
 0x3ff   :  { %v2255_v10 = vand.u32 2147483647, %v2250_v9 }
 0x401   :  { %v2256_v11 = vadd.f32 1.0, %v2255_v10 }
 0x403   :  { %2984 = vrcp.f32 %v2256_v11 }
 0x40d   :  { %v2985_v12 = vpop.eup %2984 }
 0x40e   :  { %v2258_v13 = vmul.f32 %v2985_v12, %v2250_v9 }
 0x410   :  { %v2260_v14 = vsel %vm2259_vm2, %v2258_v13, 0.0 }
 0x411   :  { %2261 = vadd.xlane.f32.xlu0 %v2260_v14 }
 0x427   :  { %2267 = vperm.xlu0 %2841, %v2250_v9  }
 0x49e   :  { %v2262_v15 = vpop.xlane.xlu0 %2261 }
 0x49f   :  { %v2264_v18 = vmul.f32 0.14285715, %v2262_v15 }
 0x4a6   :  { %v2268_v17 = vpop.permute.xlu0 %2267 }
 0x4a7   :  { %v2270_v20 = vadd.f32 %v2268_v17, %v2258_v13 }
 0x4a9   :  { %v2271_v21 = vsub.f32 %v2270_v20, %v2264_v18 }
 0x4ab   :  { %2272 = vst [vmem:[#allocation2] sm:$0x3] %v2271_v21 }
 0x4ac   :  { %2997 = shalt.err (!%p2994_p4)
}
 0x4ad   :  { %s2998_s12 = scalar_lea.hbm %s3735_s9, 32 }
 0x4ae   :  { %p2999_p5 = scmp.ne.s32.totalorder %s3735_s9, %s2998_s12  ;;  %p3002_p6 = scmp.lt.u32.totalorder %s2998_s12, %s3735_s9 }
 0x4b0   :  { %p3004_p7 = pnand %p3002_p6, %p2999_p5 }
 0x4b2   :  { %3007 = shalt.err (!%p3004_p7)
}
 0x4b3   :  { %2282 = dma.vmem_to_hbm [thread:$0]  %s2280_s8, 32, %s3735_s9, [#allocation3]  }
 0x4b4   :  { %3008 = dma.done.wait [#allocation3], 32  }
 0x4b5   :  { %3009 = vsyncadd [#allocation3], 4294967264 }
 0x4b6   :  { %2286 = vsyncpa [#allocation3], 1 }

</bundles_post_ra>
